<compile_context>
chip_gen: v6e
topology: v6e:2x2x1
jax: 0.10.0
libtpu: 0.0.40
codegen_flags: <defaults>
</compile_context>

<pallas_src>
import functools
import math

import jax
import jax.numpy as jnp
from jax import lax
from jax.experimental import pallas as pl
from jax.experimental.pallas import tpu as pltpu


_LANES = 128
_NEG_BIG = -1e30                       # finite "-inf": exp underflows to 0, never NaN
_RESIDENT_KEY_BYTES = 12 * 1024 * 1024 # resident-key budget (v7x 64 MiB VMEM safe)


def _pick_tile(n, candidates):
    """Largest candidate that evenly divides n, else n itself."""
    for c in candidates:
        if n % c == 0:
            return c
    return n


# ---------------------------------------------------------------------------
# MSE kernel:  sum((x - t)^2) accumulated into a lane-dense (8, 128) block
# ---------------------------------------------------------------------------
def _mse_kernel(x_ref, t_ref, out_ref):
    @pl.when(pl.program_id(0) == 0)
    def _():
        out_ref[...] = jnp.zeros(out_ref.shape, out_ref.dtype)

    d = x_ref[...].astype(jnp.float32) - t_ref[...].astype(jnp.float32)
    d2 = d * d
    tm, c = d2.shape
    # (tm, C) -> (tm//8, 8, C) only splits the major dim (layout-trivial);
    # the axis-0 sum is pure VPU vreg adds, no cross-lane XLU reduce per step.
    out_ref[...] += jnp.sum(d2.reshape(tm // 8, 8, c), axis=0)


def mse_loss(x, target):
    assert x.shape == target.shape
    n = x.size
    xf = x.reshape(-1)
    tf = target.reshape(-1)

    rows_raw = pl.cdiv(n, _LANES)
    tm = int(min(4096, pl.next_power_of_2(max(rows_raw, 8))))  # big pow2 row tile
    rows = pl.cdiv(rows_raw, tm) * tm
    n_pad = rows * _LANES
    if n_pad != n:
        # zero padding contributes (0-0)^2 = 0 to the sum; divide by true n below
        xf = jnp.pad(xf, (0, n_pad - n))
        tf = jnp.pad(tf, (0, n_pad - n))
    x2 = xf.reshape(rows, _LANES)      # native dtype; upcast happens in-kernel
    t2 = tf.reshape(rows, _LANES)

    blk_bytes = tm * _LANES * (x2.dtype.itemsize + t2.dtype.itemsize)
    vmem_limit = int(min(48 << 20, max(24 << 20, 2 * blk_bytes + (2 << 20))))

    partial = pl.pallas_call(
        _mse_kernel,
        out_shape=jax.ShapeDtypeStruct((8, _LANES), jnp.float32),
        grid=(rows // tm,),
        in_specs=[
            pl.BlockSpec((tm, _LANES), lambda i: (i, 0)),
            pl.BlockSpec((tm, _LANES), lambda i: (i, 0)),
        ],
        out_specs=pl.BlockSpec((8, _LANES), lambda i: (0, 0)),
        compiler_params=pltpu.CompilerParams(
            dimension_semantics=("arbitrary",),
            vmem_limit_bytes=vmem_limit,
        ),
    )(x2, t2)
    return jnp.sum(partial) / jnp.float32(n)


# ---------------------------------------------------------------------------
# NT-Xent kernels
# ---------------------------------------------------------------------------
def _l2_normalize_kernel(z_ref, xn_ref, *, scale):
    z = z_ref[...].astype(jnp.float32)
    ss = jnp.sum(z * z, axis=-1, keepdims=True)
    # rsqrt -> EUP; max(ss, 1e-16) == clamping ||z|| at 1e-8 (PyTorch eps).
    # sqrt(1/temperature) is folded in here so the (T,T) tiles never rescale.
    inv = lax.rsqrt(jnp.maximum(ss, jnp.float32(1e-16))) * jnp.float32(scale)
    xn_ref[...] = (z * inv).astype(xn_ref.dtype)


def _ntxent_tile_kernel(q_ref, k_ref, loss_ref, m_ref, l_ref, tgt_ref, *,
                        tile, n_real, n_pad, keys_resident):
    i = pl.program_id(0)            # row-tile index    ("parallel")
    j = pl.program_id(1)            # column-tile index ("arbitrary", reduction)
    T = tile
    neg_big = jnp.float32(_NEG_BIG)

    @pl.when(j == 0)
    def _():
        m_ref[...] = jnp.full(m_ref.shape, neg_big, jnp.float32)
        l_ref[...] = jnp.zeros(l_ref.shape, jnp.float32)
        tgt_ref[...] = jnp.zeros(tgt_ref.shape, jnp.float32)

    if keys_resident:
        col0 = pl.multiple_of(j * T, T)
        k = k_ref[pl.ds(col0, T), :]          # slice of the VMEM-resident keys
    else:
        k = k_ref[...]                        # streamed (T, D) key tile

    # MXU: q . k^T without materializing a transpose (contract last dims),
    # bf16 inputs / f32 accumulation.  1/temp is already folded into q and k.
    s = lax.dot_general(
        q_ref[...], k,
        dimension_numbers=(((1,), (1,)), ((), ())),
        preferred_element_type=jnp.float32,
    )                                         # (T, T) logits tile

    if n_pad != n_real:
        # Padded key columns must not contribute to the softmax denominator.
        # (This branch only exists when B actually needed padding.)
        c_global = j * T + lax.broadcasted_iota(jnp.int32, (T, T), 1)
        s = jnp.where(c_global >= n_real, neg_big, s)

    def _online_lse(s_val):
        m_prev = m_ref[...]
        m_new = jnp.maximum(m_prev, jnp.max(s_val, axis=-1, keepdims=True))
        alpha = jnp.exp(m_prev - m_new)
        l_ref[...] = alpha * l_ref[...] + jnp.sum(jnp.exp(s_val - m_new),
                                                  axis=-1, keepdims=True)
        m_ref[...] = m_new

    @pl.when(i != j)
    def _():
        _online_lse(s)              # fast path: no iotas / compares / selects

    @pl.when(i == j)
    def _():
        # Diagonal tile: extract the positive-pair logit (row r pairs with
        # r ^ 1; T and the tile start i*T are even, so the pair is always
        # local) and mask the self-similarity diagonal before the LSE update.
        r_idx = lax.broadcasted_iota(jnp.int32, (T, T), 0)
        c_idx = lax.broadcasted_iota(jnp.int32, (T, T), 1)
        tgt_ref[...] = jnp.sum(
            jnp.where(c_idx == (r_idx ^ 1), s, 0.0), axis=-1, keepdims=True)
        _online_lse(jnp.where(r_idx == c_idx, neg_big, s))

    @pl.when(j == pl.num_programs(1) - 1)
    def _():
        # per-row cross-entropy:  logsumexp(row) - target_logit
        loss_ref[...] = m_ref[...] + jnp.log(l_ref[...]) - tgt_ref[...]


def ntxent_loss(z, temperature, *, matmul_dtype=jnp.bfloat16):
    """Pallas NT-Xent.  Returns (loss, {'loss': loss, 'ntxent': loss})."""
    assert z.ndim == 2
    B, D = z.shape
    assert B % 2 == 0, "NT-Xent needs an even batch (2N augmented views)."

    # MXU-friendly tile; pad B up to a multiple of it rather than shrinking T.
    if B % 256 == 0:
        T = 256
    elif B % 128 == 0:
        T = 128
    else:
        T = 256 if B > 512 else 128
    B_pad = pl.cdiv(B, T) * T
    n_tiles = B_pad // T
    z_pad = jnp.pad(z, ((0, B_pad - B), (0, 0))) if B_pad != B else z

    # Stage 1: normalize once (sqrt(1/temp) folded in), keep a bf16 resident
    # copy: one pass over z, halves key DMA bytes, feeds the MXU at bf16 rate.
    scale = 1.0 / math.sqrt(float(temperature))
    Tn = _pick_tile(B_pad, (2048, 1024, 512, 256, 128))
    xn = pl.pallas_call(
        functools.partial(_l2_normalize_kernel, scale=scale),
        out_shape=jax.ShapeDtypeStruct((B_pad, D), matmul_dtype),
        grid=(B_pad // Tn,),
        in_specs=[pl.BlockSpec((Tn, D), lambda i: (i, 0))],
        out_specs=pl.BlockSpec((Tn, D), lambda i: (i, 0)),
        compiler_params=pltpu.CompilerParams(
            dimension_semantics=("parallel",)),
    )(z_pad)

    # Stage 2: flash-style tiled similarity + online LSE + per-row CE.
    itemsize = jnp.dtype(matmul_dtype).itemsize
    keys_resident = B_pad * D * itemsize <= _RESIDENT_KEY_BYTES
    if keys_resident:
        key_spec = pl.BlockSpec((B_pad, D), lambda i, j: (0, 0))  # fetched once
        key_block_bytes = B_pad * D * itemsize
    else:
        key_spec = pl.BlockSpec((T, D), lambda i, j: (j, 0))      # streamed
        key_block_bytes = T * D * itemsize

    est = (2 * key_block_bytes + 2 * T * D * itemsize
           + 8 * T * T * 4 + 8 * T * 4 + (2 << 20))
    vmem_limit = int(min(48 << 20, max(24 << 20, est)))

    kernel = functools.partial(
        _ntxent_tile_kernel, tile=T, n_real=B, n_pad=B_pad,
        keys_resident=keys_resident)
    per_row = pl.pallas_call(
        kernel,
        out_shape=jax.ShapeDtypeStruct((B_pad, 1), jnp.float32),
        grid=(n_tiles, n_tiles),
        in_specs=[
            pl.BlockSpec((T, D), lambda i, j: (i, 0)),   # query rows
            key_spec,                                     # keys
        ],
        out_specs=pl.BlockSpec((T, 1), lambda i, j: (i, 0)),
        scratch_shapes=[pltpu.VMEM((T, 1), jnp.float32)] * 3,   # m, l, tgt
        compiler_params=pltpu.CompilerParams(
            dimension_semantics=("parallel", "arbitrary"),
            vmem_limit_bytes=vmem_limit,
        ),
    )(xn, xn)

    loss = jnp.mean(per_row[:B, 0])   # drop padded rows
    return loss, {"loss": loss, "ntxent": loss}


# ---------------------------------------------------------------------------
# AutoassociativeLoss forward
# ---------------------------------------------------------------------------
@functools.partial(jax.jit, static_argnames=("lmbda", "temperature"))
def autoassociative_loss(x, z, target, *, lmbda, temperature):
    mse = mse_loss(x, target)
    ntx, _ = ntxent_loss(z, temperature)
    lam = jnp.float32(lmbda)
    loss = lam * mse + (jnp.float32(1.0) - lam) * ntx
    return loss, {"loss": loss, "mse": mse, "ntxent": ntx}


# ---------------------------------------------------------------------------
# Pure-JAX references for validation
# ---------------------------------------------------------------------------
def _ntxent_ref(z, temperature, sim_dtype=jnp.float32):
    z = z.astype(jnp.float32)
    Bn = z.shape[0]
    ss = jnp.sum(z * z, axis=-1, keepdims=True)
    scale = 1.0 / math.sqrt(float(temperature))
    xn = (z * lax.rsqrt(jnp.maximum(ss, 1e-16)) * scale).astype(sim_dtype)
    logits = jnp.dot(xn, xn.T, preferred_element_type=jnp.float32)
    logits = jnp.where(jnp.eye(Bn, dtype=bool), -jnp.inf, logits)
    tgt = jnp.arange(Bn) ^ 1
    logprobs = jax.nn.log_softmax(logits, axis=-1)
    return -jnp.mean(logprobs[jnp.arange(Bn), tgt])


if __name__ == "__main__":
    key = jax.random.PRNGKey(0)
    kx, kz, kt = jax.random.split(key, 3)

    B, C, H, W = 8, 4, 8, 8       # reconstruction tensors for the MSE term
    D = 32                        # projection dim for the NT-Xent term
    x = jax.random.normal(kx, (B, C, H, W), dtype=jnp.float32)
    target = jax.random.normal(kt, (B, C, H, W), dtype=jnp.float32)
    z = jax.random.normal(kz, (B, D), dtype=jnp.float32)
    lmbda, temperature = 0.3, 0.5

    loss, aux = autoassociative_loss(x, z, target, lmbda=lmbda,
                                     temperature=temperature)
    jax.block_until_ready(loss)

    # references
    mse_ref = jnp.mean((x - target) ** 2)
    ntx_ref_f32 = _ntxent_ref(z, temperature, jnp.float32)
    ntx_ref_bf16 = _ntxent_ref(z, temperature, jnp.bfloat16)  # bf16-sim consistent
    loss_ref = lmbda * mse_ref + (1.0 - lmbda) * ntx_ref_f32

    assert jnp.allclose(aux["mse"], mse_ref, rtol=1e-4, atol=1e-5), (aux["mse"], mse_ref)
    assert jnp.allclose(aux["ntxent"], ntx_ref_bf16, rtol=5e-3, atol=5e-3), (
        aux["ntxent"], ntx_ref_bf16)
    assert jnp.allclose(aux["ntxent"], ntx_ref_f32, rtol=5e-2, atol=5e-2), (
        aux["ntxent"], ntx_ref_f32)
    assert jnp.allclose(loss, loss_ref, rtol=5e-2, atol=5e-2), (loss, loss_ref)
    assert jnp.allclose(aux["loss"], loss)

    print("KERNEL_OK")
</pallas_src>

<mosaic_0001>
module attributes {stable_mosaic.version = 11 : i64} {
  func.func @_l2_normalize_kernel(%arg0: i32, %arg1: memref<128x32xf32, #tpu.memory_space<vmem>>, %arg2: memref<128x32xbf16, #tpu.memory_space<vmem>>) attributes {dimension_semantics = [#tpu.dimension_semantics<parallel>], iteration_bounds = array<i64: 1>, scalar_prefetch = 0 : i64, scratch_operands = 0 : i64, tpu.core_type = #tpu.core_type<tc>, window_params = [{transform_indices = @transform_0, window_bounds = array<i64: 128, 32>}, {transform_indices = @transform_1, window_bounds = array<i64: 128, 32>}]} {
    %c0 = arith.constant 0 : index
    %c0_0 = arith.constant 0 : index
    %0 = vector.load %arg1[%c0, %c0_0] : memref<128x32xf32, #tpu.memory_space<vmem>>, vector<128x32xf32>
    %1 = arith.mulf %0, %0 : vector<128x32xf32>
    %cst = arith.constant dense<0.000000e+00> : vector<128xf32>
    %2 = vector.multi_reduction <add>, %1, %cst [1] : vector<128x32xf32> to vector<128xf32>
    %3 = vector.shape_cast %2 : vector<128xf32> to vector<128x1xf32>
    %cst_1 = arith.constant 1.000000e-16 : f32
    %4 = vector.broadcast %cst_1 : f32 to vector<128x1xf32>
    %5 = arith.maximumf %3, %4 : vector<128x1xf32>
    %6 = math.rsqrt %5 : vector<128x1xf32>
    %cst_2 = arith.constant 1.41421354 : f32
    %7 = vector.broadcast %cst_2 : f32 to vector<128x1xf32>
    %8 = arith.mulf %6, %7 : vector<128x1xf32>
    %9 = vector.broadcast %8 : vector<128x1xf32> to vector<128x32xf32>
    %10 = arith.mulf %0, %9 : vector<128x32xf32>
    %11 = arith.truncf %10 : vector<128x32xf32> to vector<128x32xbf16>
    %c0_3 = arith.constant 0 : index
    %c0_4 = arith.constant 0 : index
    %12 = vector.load %arg2[%c0_3, %c0_4] : memref<128x32xbf16, #tpu.memory_space<vmem>>, vector<128x32xbf16>
    tpu.vector_store %arg2[%c0_3, %c0_4], %11 {strides = array<i32>} : memref<128x32xbf16, #tpu.memory_space<vmem>>, vector<128x32xbf16>,
    return
  }
  func.func @transform_0(%arg0: i32) -> (i32, i32) {
    %c0_i32 = arith.constant 0 : i32
    %c0_i32_0 = arith.constant 0 : i32
    return %arg0, %c0_i32 : i32, i32
  }
  func.func @transform_1(%arg0: i32) -> (i32, i32) {
    %c0_i32 = arith.constant 0 : i32
    %c0_i32_0 = arith.constant 0 : i32
    return %arg0, %c0_i32 : i32, i32
  }
}

module attributes {stable_mosaic.version = 11 : i64} {
  func.func @_ntxent_tile_kernel(%arg0: i32, %arg1: i32, %arg2: memref<128x32xbf16, #tpu.memory_space<vmem>>, %arg3: memref<128x32xbf16, #tpu.memory_space<vmem>>, %arg4: memref<128x1xf32, #tpu.memory_space<vmem>>, %arg5: memref<128x1xf32, #tpu.memory_space<vmem>>, %arg6: memref<128x1xf32, #tpu.memory_space<vmem>>, %arg7: memref<128x1xf32, #tpu.memory_space<vmem>>) attributes {dimension_semantics = [#tpu.dimension_semantics<parallel>, #tpu.dimension_semantics<arbitrary>], iteration_bounds = array<i64: 1, 1>, scalar_prefetch = 0 : i64, scratch_operands = 3 : i64, tpu.core_type = #tpu.core_type<tc>, window_params = [{transform_indices = @transform_0, window_bounds = array<i64: 128, 32>}, {pipeline_mode = #tpu.pipeline_mode<synchronous>, transform_indices = @transform_1, window_bounds = array<i64: 128, 32>}, {transform_indices = @transform_2, window_bounds = array<i64: 128, 1>}]} {
    %c0_i32 = arith.constant 0 : i32
    %0 = arith.cmpi eq, %arg1, %c0_i32 : i32
    %1 = arith.extui %0 : i1 to i32
    %cst = arith.constant -1.000000e+30 : f32
    %c0_i32_0 = arith.constant 0 : i32
    %2 = arith.cmpi ne, %1, %c0_i32_0 : i32
    scf.if %2 {
      %26 = vector.broadcast %cst : f32 to vector<128x1xf32>
      %c0_11 = arith.constant 0 : index
      %c0_12 = arith.constant 0 : index
      %27 = vector.load %arg5[%c0_11, %c0_12] : memref<128x1xf32, #tpu.memory_space<vmem>>, vector<128x1xf32>
      tpu.vector_store %arg5[%c0_11, %c0_12], %26 {strides = array<i32>} : memref<128x1xf32, #tpu.memory_space<vmem>>, vector<128x1xf32>,
      %cst_13 = arith.constant 0.000000e+00 : f32
      %28 = vector.broadcast %cst_13 : f32 to vector<128x1xf32>
      %c0_14 = arith.constant 0 : index
      %c0_15 = arith.constant 0 : index
      %29 = vector.load %arg6[%c0_14, %c0_15] : memref<128x1xf32, #tpu.memory_space<vmem>>, vector<128x1xf32>
      tpu.vector_store %arg6[%c0_14, %c0_15], %28 {strides = array<i32>} : memref<128x1xf32, #tpu.memory_space<vmem>>, vector<128x1xf32>,
      %cst_16 = arith.constant 0.000000e+00 : f32
      %30 = vector.broadcast %cst_16 : f32 to vector<128x1xf32>
      %c0_17 = arith.constant 0 : index
      %c0_18 = arith.constant 0 : index
      %31 = vector.load %arg7[%c0_17, %c0_18] : memref<128x1xf32, #tpu.memory_space<vmem>>, vector<128x1xf32>
      tpu.vector_store %arg7[%c0_17, %c0_18], %30 {strides = array<i32>} : memref<128x1xf32, #tpu.memory_space<vmem>>, vector<128x1xf32>,
    } else {
    }
    %c128_i32 = arith.constant 128 : i32
    %3 = arith.muli %arg1, %c128_i32 : i32
    %4 = tpu.assume_multiple %3, 128 : i32
    %5 = arith.index_cast %4 : i32 to index
    %c0 = arith.constant 0 : index
    %6 = vector.load %arg3[%5, %c0] : memref<128x32xbf16, #tpu.memory_space<vmem>>, vector<128x32xbf16>
    %c0_1 = arith.constant 0 : index
    %c0_2 = arith.constant 0 : index
    %7 = vector.load %arg2[%c0_1, %c0_2] : memref<128x32xbf16, #tpu.memory_space<vmem>>, vector<128x32xbf16>
    %cst_3 = arith.constant dense<0.000000e+00> : vector<128x128xf32>
    %8 = tpu.matmul %7, %6, %cst_3 {dimension_numbers = #tpu.dot_dimension_numbers<[1], [1], [0], [0], [0, 0, 1, 0], [], []>} : vector<128x32xbf16>, vector<128x32xbf16>, vector<128x128xf32> -> vector<128x128xf32>
    %c128_i32_4 = arith.constant 128 : i32
    %9 = arith.muli %arg1, %c128_i32_4 : i32
    %10 = tpu.iota {dimensions = array<i32: 1>} : vector<128x128xi32>
    %11 = vector.broadcast %9 : i32 to vector<128x128xi32>
    %12 = arith.addi %11, %10 : vector<128x128xi32>
    %c8_i32 = arith.constant 8 : i32
    %13 = vector.broadcast %c8_i32 : i32 to vector<128x128xi32>
    %14 = arith.cmpi sge, %12, %13 : vector<128x128xi32>
    %cst_5 = arith.constant -1.000000e+30 : f32
    %15 = vector.broadcast %cst_5 : f32 to vector<128x128xf32>
    %16 = arith.select %14, %15, %8 : vector<128x128xi1>, vector<128x128xf32>
    %17 = arith.cmpi ne, %arg0, %arg1 : i32
    %18 = arith.extui %17 : i1 to i32
    %c0_i32_6 = arith.constant 0 : i32
    %19 = arith.cmpi ne, %18, %c0_i32_6 : i32
    scf.if %19 {
      %c0_11 = arith.constant 0 : index
      %c0_12 = arith.constant 0 : index
      %26 = vector.load %arg5[%c0_11, %c0_12] : memref<128x1xf32, #tpu.memory_space<vmem>>, vector<128x1xf32>
      %cst_13 = arith.constant dense<0xFF800000> : vector<128xf32>
      %27 = vector.multi_reduction <maximumf>, %16, %cst_13 [1] : vector<128x128xf32> to vector<128xf32>
      %28 = vector.shape_cast %27 : vector<128xf32> to vector<128x1xf32>
      %29 = arith.maximumf %26, %28 : vector<128x1xf32>
      %30 = arith.subf %26, %29 : vector<128x1xf32>
      %31 = math.exp %30 : vector<128x1xf32>
      %c0_14 = arith.constant 0 : index
      %c0_15 = arith.constant 0 : index
      %32 = vector.load %arg6[%c0_14, %c0_15] : memref<128x1xf32, #tpu.memory_space<vmem>>, vector<128x1xf32>
      %33 = arith.mulf %31, %32 : vector<128x1xf32>
      %34 = vector.broadcast %29 : vector<128x1xf32> to vector<128x128xf32>
      %35 = arith.subf %16, %34 : vector<128x128xf32>
      %36 = math.exp %35 : vector<128x128xf32>
      %cst_16 = arith.constant dense<0.000000e+00> : vector<128xf32>
      %37 = vector.multi_reduction <add>, %36, %cst_16 [1] : vector<128x128xf32> to vector<128xf32>
      %38 = vector.shape_cast %37 : vector<128xf32> to vector<128x1xf32>
      %39 = arith.addf %33, %38 : vector<128x1xf32>
      %c0_17 = arith.constant 0 : index
      %c0_18 = arith.constant 0 : index
      %40 = vector.load %arg6[%c0_17, %c0_18] : memref<128x1xf32, #tpu.memory_space<vmem>>, vector<128x1xf32>
      tpu.vector_store %arg6[%c0_17, %c0_18], %39 {strides = array<i32>} : memref<128x1xf32, #tpu.memory_space<vmem>>, vector<128x1xf32>,
      %c0_19 = arith.constant 0 : index
      %c0_20 = arith.constant 0 : index
      %41 = vector.load %arg5[%c0_19, %c0_20] : memref<128x1xf32, #tpu.memory_space<vmem>>, vector<128x1xf32>
      tpu.vector_store %arg5[%c0_19, %c0_20], %29 {strides = array<i32>} : memref<128x1xf32, #tpu.memory_space<vmem>>, vector<128x1xf32>,
    } else {
    }
    %20 = arith.cmpi eq, %arg0, %arg1 : i32
    %21 = arith.extui %20 : i1 to i32
    %cst_7 = arith.constant -1.000000e+30 : f32
    %c0_i32_8 = arith.constant 0 : i32
    %22 = arith.cmpi ne, %21, %c0_i32_8 : i32
    scf.if %22 {
      %26 = tpu.iota {dimensions = array<i32: 0>} : vector<128x128xi32>
      %27 = tpu.iota {dimensions = array<i32: 1>} : vector<128x128xi32>
      %c1_i32 = arith.constant 1 : i32
      %28 = vector.broadcast %c1_i32 : i32 to vector<128x128xi32>
      %29 = arith.xori %26, %28 : vector<128x128xi32>
      %30 = arith.cmpi eq, %27, %29 : vector<128x128xi32>
      %cst_11 = arith.constant 0.000000e+00 : f32
      %31 = vector.broadcast %cst_11 : f32 to vector<128x128xf32>
      %32 = arith.select %30, %16, %31 : vector<128x128xi1>, vector<128x128xf32>
      %cst_12 = arith.constant dense<0.000000e+00> : vector<128xf32>
      %33 = vector.multi_reduction <add>, %32, %cst_12 [1] : vector<128x128xf32> to vector<128xf32>
      %34 = vector.shape_cast %33 : vector<128xf32> to vector<128x1xf32>
      %c0_13 = arith.constant 0 : index
      %c0_14 = arith.constant 0 : index
      %35 = vector.load %arg7[%c0_13, %c0_14] : memref<128x1xf32, #tpu.memory_space<vmem>>, vector<128x1xf32>
      tpu.vector_store %arg7[%c0_13, %c0_14], %34 {strides = array<i32>} : memref<128x1xf32, #tpu.memory_space<vmem>>, vector<128x1xf32>,
      %36 = arith.cmpi eq, %26, %27 : vector<128x128xi32>
      %37 = vector.broadcast %cst_7 : f32 to vector<128x128xf32>
      %38 = arith.select %36, %37, %16 : vector<128x128xi1>, vector<128x128xf32>
      %c0_15 = arith.constant 0 : index
      %c0_16 = arith.constant 0 : index
      %39 = vector.load %arg5[%c0_15, %c0_16] : memref<128x1xf32, #tpu.memory_space<vmem>>, vector<128x1xf32>
      %cst_17 = arith.constant dense<0xFF800000> : vector<128xf32>
      %40 = vector.multi_reduction <maximumf>, %38, %cst_17 [1] : vector<128x128xf32> to vector<128xf32>
      %41 = vector.shape_cast %40 : vector<128xf32> to vector<128x1xf32>
      %42 = arith.maximumf %39, %41 : vector<128x1xf32>
      %43 = arith.subf %39, %42 : vector<128x1xf32>
      %44 = math.exp %43 : vector<128x1xf32>
      %c0_18 = arith.constant 0 : index
      %c0_19 = arith.constant 0 : index
      %45 = vector.load %arg6[%c0_18, %c0_19] : memref<128x1xf32, #tpu.memory_space<vmem>>, vector<128x1xf32>
      %46 = arith.mulf %44, %45 : vector<128x1xf32>
      %47 = vector.broadcast %42 : vector<128x1xf32> to vector<128x128xf32>
      %48 = arith.subf %38, %47 : vector<128x128xf32>
      %49 = math.exp %48 : vector<128x128xf32>
      %cst_20 = arith.constant dense<0.000000e+00> : vector<128xf32>
      %50 = vector.multi_reduction <add>, %49, %cst_20 [1] : vector<128x128xf32> to vector<128xf32>
      %51 = vector.shape_cast %50 : vector<128xf32> to vector<128x1xf32>
      %52 = arith.addf %46, %51 : vector<128x1xf32>
      %c0_21 = arith.constant 0 : index
      %c0_22 = arith.constant 0 : index
      %53 = vector.load %arg6[%c0_21, %c0_22] : memref<128x1xf32, #tpu.memory_space<vmem>>, vector<128x1xf32>
      tpu.vector_store %arg6[%c0_21, %c0_22], %52 {strides = array<i32>} : memref<128x1xf32, #tpu.memory_space<vmem>>, vector<128x1xf32>,
      %c0_23 = arith.constant 0 : index
      %c0_24 = arith.constant 0 : index
      %54 = vector.load %arg5[%c0_23, %c0_24] : memref<128x1xf32, #tpu.memory_space<vmem>>, vector<128x1xf32>
      tpu.vector_store %arg5[%c0_23, %c0_24], %42 {strides = array<i32>} : memref<128x1xf32, #tpu.memory_space<vmem>>, vector<128x1xf32>,
    } else {
    }
    %c0_i32_9 = arith.constant 0 : i32
    %23 = arith.cmpi eq, %arg1, %c0_i32_9 : i32
    %24 = arith.extui %23 : i1 to i32
    %c0_i32_10 = arith.constant 0 : i32
    %25 = arith.cmpi ne, %24, %c0_i32_10 : i32
    scf.if %25 {
      %c0_11 = arith.constant 0 : index
      %c0_12 = arith.constant 0 : index
      %26 = vector.load %arg5[%c0_11, %c0_12] : memref<128x1xf32, #tpu.memory_space<vmem>>, vector<128x1xf32>
      %c0_13 = arith.constant 0 : index
      %c0_14 = arith.constant 0 : index
      %27 = vector.load %arg6[%c0_13, %c0_14] : memref<128x1xf32, #tpu.memory_space<vmem>>, vector<128x1xf32>
      %28 = math.log %27 : vector<128x1xf32>
      %29 = arith.addf %26, %28 : vector<128x1xf32>
      %c0_15 = arith.constant 0 : index
      %c0_16 = arith.constant 0 : index
      %30 = vector.load %arg7[%c0_15, %c0_16] : memref<128x1xf32, #tpu.memory_space<vmem>>, vector<128x1xf32>
      %31 = arith.subf %29, %30 : vector<128x1xf32>
      %c0_17 = arith.constant 0 : index
      %c0_18 = arith.constant 0 : index
      %32 = vector.load %arg4[%c0_17, %c0_18] : memref<128x1xf32, #tpu.memory_space<vmem>>, vector<128x1xf32>
      tpu.vector_store %arg4[%c0_17, %c0_18], %31 {strides = array<i32>} : memref<128x1xf32, #tpu.memory_space<vmem>>, vector<128x1xf32>,
    } else {
    }
    return
  }
  func.func @transform_0(%arg0: i32, %arg1: i32) -> (i32, i32) {
    %c0_i32 = arith.constant 0 : i32
    %c0_i32_0 = arith.constant 0 : i32
    return %arg0, %c0_i32 : i32, i32
  }
  func.func @transform_1(%arg0: i32, %arg1: i32) -> (i32, i32) {
    %c0_i32 = arith.constant 0 : i32
    %c0_i32_0 = arith.constant 0 : i32
    %c0_i32_1 = arith.constant 0 : i32
    return %c0_i32, %c0_i32_0 : i32, i32
  }
  func.func @transform_2(%arg0: i32, %arg1: i32) -> (i32, i32) {
    %c0_i32 = arith.constant 0 : i32
    %c0_i32_0 = arith.constant 0 : i32
    return %arg0, %c0_i32 : i32, i32
  }
}

module attributes {stable_mosaic.version = 11 : i64} {
  func.func @_mse_kernel(%arg0: i32, %arg1: memref<16x128xf32, #tpu.memory_space<vmem>>, %arg2: memref<16x128xf32, #tpu.memory_space<vmem>>, %arg3: memref<8x128xf32, #tpu.memory_space<vmem>>) attributes {dimension_semantics = [#tpu.dimension_semantics<arbitrary>], iteration_bounds = array<i64: 1>, scalar_prefetch = 0 : i64, scratch_operands = 0 : i64, tpu.core_type = #tpu.core_type<tc>, window_params = [{transform_indices = @transform_0, window_bounds = array<i64: 16, 128>}, {transform_indices = @transform_1, window_bounds = array<i64: 16, 128>}, {pipeline_mode = #tpu.pipeline_mode<synchronous>, transform_indices = @transform_2, window_bounds = array<i64: 8, 128>}]} {
    %c0_i32 = arith.constant 0 : i32
    %0 = arith.cmpi eq, %arg0, %c0_i32 : i32
    %1 = arith.extui %0 : i1 to i32
    %c0_i32_0 = arith.constant 0 : i32
    %2 = arith.cmpi ne, %1, %c0_i32_0 : i32
    scf.if %2 {
      %cst_8 = arith.constant 0.000000e+00 : f32
      %12 = vector.broadcast %cst_8 : f32 to vector<8x128xf32>
      %c0_9 = arith.constant 0 : index
      %c0_10 = arith.constant 0 : index
      %13 = vector.load %arg3[%c0_9, %c0_10] : memref<8x128xf32, #tpu.memory_space<vmem>>, vector<8x128xf32>
      tpu.vector_store %arg3[%c0_9, %c0_10], %12 {strides = array<i32>} : memref<8x128xf32, #tpu.memory_space<vmem>>, vector<8x128xf32>,
    } else {
    }
    %c0 = arith.constant 0 : index
    %c0_1 = arith.constant 0 : index
    %3 = vector.load %arg1[%c0, %c0_1] : memref<16x128xf32, #tpu.memory_space<vmem>>, vector<16x128xf32>
    %c0_2 = arith.constant 0 : index
    %c0_3 = arith.constant 0 : index
    %4 = vector.load %arg2[%c0_2, %c0_3] : memref<16x128xf32, #tpu.memory_space<vmem>>, vector<16x128xf32>
    %5 = arith.subf %3, %4 : vector<16x128xf32>
    %6 = arith.mulf %5, %5 : vector<16x128xf32>
    %c0_4 = arith.constant 0 : index
    %c0_5 = arith.constant 0 : index
    %7 = vector.load %arg3[%c0_4, %c0_5] : memref<8x128xf32, #tpu.memory_space<vmem>>, vector<8x128xf32>
    %8 = vector.shape_cast %6 : vector<16x128xf32> to vector<2x8x128xf32>
    %cst = arith.constant dense<0.000000e+00> : vector<8x128xf32>
    %9 = vector.multi_reduction <add>, %8, %cst [0] : vector<2x8x128xf32> to vector<8x128xf32>
    %10 = arith.addf %7, %9 : vector<8x128xf32>
    %c0_6 = arith.constant 0 : index
    %c0_7 = arith.constant 0 : index
    %11 = vector.load %arg3[%c0_6, %c0_7] : memref<8x128xf32, #tpu.memory_space<vmem>>, vector<8x128xf32>
    tpu.vector_store %arg3[%c0_6, %c0_7], %10 {strides = array<i32>} : memref<8x128xf32, #tpu.memory_space<vmem>>, vector<8x128xf32>,
    return
  }
  func.func @transform_0(%arg0: i32) -> (i32, i32) {
    %c0_i32 = arith.constant 0 : i32
    %c0_i32_0 = arith.constant 0 : i32
    return %arg0, %c0_i32 : i32, i32
  }
  func.func @transform_1(%arg0: i32) -> (i32, i32) {
    %c0_i32 = arith.constant 0 : i32
    %c0_i32_0 = arith.constant 0 : i32
    return %arg0, %c0_i32 : i32, i32
  }
  func.func @transform_2(%arg0: i32) -> (i32, i32) {
    %c0_i32 = arith.constant 0 : i32
    %c0_i32_0 = arith.constant 0 : i32
    %c0_i32_1 = arith.constant 0 : i32
    return %c0_i32, %c0_i32_0 : i32, i32
  }
}

</mosaic_0001>

<bundles_post_ra>
// kernel: autoassociative_loss.3
= control target key start
LH: loop header
LB: loop body
LE: loop exit
PB: predicated region body
PF: predicated region fallthrough
CT: control target
= control target key end

     0   :  { %s63_s0 = inlined_call_operand.vmem [shape: f32[16,128], index: 0, kind: input, shape index: {}]   ;;  %s64_s1 = inlined_call_operand.vmem [shape: f32[16,128], index: 1, kind: input, shape index: {}]   ;;  %s65_s2 = inlined_call_operand.vmem [shape: f32[8,128], index: 2, kind: output, shape index: {}]  }
   0x1   :  { %v16_v0 = vld [vmem:[%s63_s0] sm:$0xff]  ;;  %v17_v1 = vld [vmem:[%s63_s0 + $0x8] sm:$0xff] }
   0x2   :  { %v18_v2 = vld [vmem:[%s64_s1] sm:$0xff]  ;;  %v19_v3 = vld [vmem:[%s64_s1 + $0x8] sm:$0xff] }
   0x3   :  { %v20_v4 = vsub.f32 %v16_v0, %v18_v2  ;;  %v21_v5 = vsub.f32 %v17_v1, %v19_v3 }
   0x5   :  { %v22_v6 = vmul.f32 %v20_v4, %v20_v4  ;;  %v23_v7 = vmul.f32 %v21_v5, %v21_v5 }
   0x7   :  { %v25_v8 = vadd.f32 %v23_v7, %v22_v6 }
   0x9   :  { %27 = vst [vmem:[%s65_s2] sm:$0xff] %v25_v8 }

// kernel: autoassociative_loss.4
= control target key start
LH: loop header
LB: loop body
LE: loop exit
PB: predicated region body
PF: predicated region fallthrough
CT: control target
= control target key end

     0   :  { %vm40_vm0 = vcmask 261120   ;;  %vm217_vm1 = vcmask 257024   ;;  %s520_s0 = inlined_call_operand.vmem [shape: f32[128,32], index: 0, kind: input, shape index: {}]   ;;  %s521_s1 = inlined_call_operand.vmem [shape: bf16[128,32], index: 1, kind: output, shape index: {}]  }
   0x1   :  { %v315_v0 = vld [vmem:[%s520_s0 + $0x10] sm:$0xff]  ;;  %v320_v1 = vld [vmem:[%s520_s0] sm:$0xff]  ;;  %v325_v2 = vld [vmem:[%s520_s0 + $0x18] sm:$0xff] }
   0x2   :  { %v26_v3 = vmul.f32 %v315_v0, %v315_v0  ;;  %v24_v4 = vmul.f32 %v320_v1, %v320_v1  ;;  %v27_v5 = vmul.f32 %v325_v2, %v325_v2  ;;  %v336_v6 = vld [vmem:[%s520_s0 + $0x8] sm:$0xff]  ;;  %v348_v9 = vld [vmem:[%s520_s0 + $0x20] sm:$0xff]  ;;  %v361_v16 = vld [vmem:[%s520_s0 + $0x38] sm:$0xff] }
   0x3   :  { %v25_v7 = vmul.f32 %v336_v6, %v336_v6  ;;  %v343_v8 = vld [vmem:[%s520_s0 + $0x28] sm:$0xff]  ;;  %v28_v15 = vmul.f32 %v348_v9, %v348_v9  ;;  %v366_v17 = vld [vmem:[%s520_s0 + $0x30] sm:$0xff]  ;;  %v31_v20 = vmul.f32 %v361_v16, %v361_v16  ;;  %v382_v23 = vld [vmem:[%s520_s0 + $0x40] sm:$0xff] }
   0x4   :  { %v47_v10 = vsel %vm40_vm0, %v26_v3, 0.0  ;;  %v41_v11 = vsel %vm40_vm0, %v24_v4, 0.0  ;;  %v50_v12 = vsel %vm40_vm0, %v27_v5, 0.0  ;;  %v29_v14 = vmul.f32 %v343_v8, %v343_v8  ;;  %v377_v22 = vld [vmem:[%s520_s0 + $0x48] sm:$0xff]  ;;  %v393_v28 = vld [vmem:[%s520_s0 + $0x58] sm:$0xff]  ;;  %v398_v29 = vld [vmem:[%s520_s0 + $0x50] sm:$0xff] }
   0x5   :  { %48 = vadd.xlane.f32.xlu1 %v47_v10  ;;  %42 = vadd.xlane.f32.xlu0 %v41_v11  ;;  %v44_v13 = vsel %vm40_vm0, %v25_v7, 0.0  ;;  %v53_v19 = vsel %vm40_vm0, %v28_v15, 0.0  ;;  %v30_v21 = vmul.f32 %v366_v17, %v366_v17  ;;  %v62_v24 = vsel %vm40_vm0, %v31_v20, 0.0  ;;  %v409_v34 = vld [vmem:[%s520_s0 + $0x68] sm:$0xff]  ;;  %v414_v35 = vld [vmem:[%s520_s0 + $0x60] sm:$0xff]  ;;  %v425_v40 = vld [vmem:[%s520_s0 + $0x78] sm:$0xff] }
   0x6   :  { %v56_v18 = vsel %vm40_vm0, %v29_v14, 0.0  ;;  %v33_v26 = vmul.f32 %v377_v22, %v377_v22  ;;  %v32_v27 = vmul.f32 %v382_v23, %v382_v23  ;;  %v35_v32 = vmul.f32 %v393_v28, %v393_v28  ;;  %v430_v41 = vld [vmem:[%s520_s0 + $0x70] sm:$0xff] }
   0x7   :  { %v59_v25 = vsel %vm40_vm0, %v30_v21, 0.0  ;;  %v34_v33 = vmul.f32 %v398_v29, %v398_v29  ;;  %v37_v38 = vmul.f32 %v409_v34, %v409_v34  ;;  %v36_v39 = vmul.f32 %v414_v35, %v414_v35 }
   0x8   :  { %v68_v30 = vsel %vm40_vm0, %v33_v26, 0.0  ;;  %v65_v31 = vsel %vm40_vm0, %v32_v27, 0.0  ;;  %v74_v36 = vsel %vm40_vm0, %v35_v32, 0.0  ;;  %v39_v44 = vmul.f32 %v425_v40, %v425_v40 }
   0x9   :  { %51 = vadd.xlane.f32.xlu1 %v50_v12  ;;  %45 = vadd.xlane.f32.xlu0 %v44_v13  ;;  %v71_v37 = vsel %vm40_vm0, %v34_v33, 0.0  ;;  %v80_v42 = vsel %vm40_vm0, %v37_v38, 0.0  ;;  %v77_v43 = vsel %vm40_vm0, %v36_v39, 0.0  ;;  %v38_v45 = vmul.f32 %v430_v41, %v430_v41 }
   0xa   :  { %v86_v46 = vsel %vm40_vm0, %v39_v44, 0.0 }
   0xb   :  { %v83_v47 = vsel %vm40_vm0, %v38_v45, 0.0 }
   0xd   :  { %57 = vadd.xlane.f32.xlu1 %v56_v18  ;;  %54 = vadd.xlane.f32.xlu0 %v53_v19 }
  0x11   :  { %63 = vadd.xlane.f32.xlu1 %v62_v24  ;;  %60 = vadd.xlane.f32.xlu0 %v59_v25 }
  0x15   :  { %69 = vadd.xlane.f32.xlu1 %v68_v30  ;;  %66 = vadd.xlane.f32.xlu0 %v65_v31 }
  0x19   :  { %75 = vadd.xlane.f32.xlu1 %v74_v36  ;;  %72 = vadd.xlane.f32.xlu0 %v71_v37 }
  0x1d   :  { %81 = vadd.xlane.f32.xlu1 %v80_v42  ;;  %78 = vadd.xlane.f32.xlu0 %v77_v43 }
  0x21   :  { %87 = vadd.xlane.f32.xlu1 %v86_v46  ;;  %84 = vadd.xlane.f32.xlu0 %v83_v47 }
  0x8e   :  { %v49_v48 = vpop.xlane.xlu1 %48  ;;  %v43_v49 = vpop.xlane.xlu0 %42 }
  0x8f   :  { %v91_v50 = vmax.f32 %v49_v48, 1e-16  ;;  %v89_v51 = vmax.f32 %v43_v49, 1e-16 }
  0x91   :  { %270 = vrsqrt.f32 %v91_v50 }
  0x92   :  { %272 = vrsqrt.f32 %v89_v51  ;;  %v52_v52 = vpop.xlane.xlu1 %51  ;;  %v46_v53 = vpop.xlane.xlu0 %45 }
  0x93   :  { %v92_v54 = vmax.f32 %v52_v52, 1e-16  ;;  %v90_v55 = vmax.f32 %v46_v53, 1e-16 }
  0x95   :  { %274 = vrsqrt.f32 %v92_v54 }
  0x96   :  { %276 = vrsqrt.f32 %v90_v55  ;;  %v58_v56 = vpop.xlane.xlu1 %57  ;;  %v55_v57 = vpop.xlane.xlu0 %54 }
  0x97   :  { %v94_v58 = vmax.f32 %v58_v56, 1e-16  ;;  %v93_v59 = vmax.f32 %v55_v57, 1e-16 }
  0x99   :  { %278 = vrsqrt.f32 %v94_v58 }
  0x9a   :  { %280 = vrsqrt.f32 %v93_v59  ;;  %v64_v60 = vpop.xlane.xlu1 %63  ;;  %v61_v61 = vpop.xlane.xlu0 %60 }
  0x9b   :  { %v96_v62 = vmax.f32 %v64_v60, 1e-16  ;;  %v95_v63 = vmax.f32 %v61_v61, 1e-16 }
  0x9d   :  { %282 = vrsqrt.f32 %v96_v62 }
  0x9e   :  { %v271_v3 = vpop.eup %270  ;;  %284 = vrsqrt.f32 %v95_v63  ;;  %v70_v4 = vpop.xlane.xlu1 %69 }
  0x9f   :  { %v67_v5 = vpop.xlane.xlu0 %66  ;;  %v273_v7 = vpop.eup %272  ;;  %v123_v10 = vmul.f32 1.4142135, %v271_v3  ;;  %v98_v11 = vmax.f32 %v70_v4, 1e-16 }
  0xa0   :  { %v97_v12 = vmax.f32 %v67_v5, 1e-16  ;;  %v121_v13 = vmul.f32 1.4142135, %v273_v7 }
  0xa1   :  { %v139_v14 = vmul.f32 %v123_v10, %v315_v0  ;;  %286 = vrsqrt.f32 %v98_v11 }
  0xa2   :  { %v275_v15 = vpop.eup %274  ;;  %v137_v18 = vmul.f32 %v121_v13, %v320_v1  ;;  %288 = vrsqrt.f32 %v97_v12  ;;  %v76_v19 = vpop.xlane.xlu1 %75 }
  0xa3   :  { %v73_v20 = vpop.xlane.xlu0 %72  ;;  %v277_v21 = vpop.eup %276  ;;  %v256_v24 = vpack.c.bf16 %v139_v14, %v139_v14  ;;  %v124_v25 = vmul.f32 1.4142135, %v275_v15  ;;  %v100_v26 = vmax.f32 %v76_v19, 1e-16 }
  0xa4   :  { %v99_v27 = vmax.f32 %v73_v20, 1e-16  ;;  %v254_v30 = vpack.c.bf16 %v137_v18, %v137_v18  ;;  %v122_v31 = vmul.f32 1.4142135, %v277_v21 }
  0xa5   :  { %220 = vst.msk [vmem:[%s521_s1 + $0x8] sm:$0xf] %vm217_vm1, %v256_v24  ;;  %v140_v0 = vmul.f32 %v124_v25, %v325_v2  ;;  %290 = vrsqrt.f32 %v100_v26 }
  0xa6   :  { %v279_v32 = vpop.eup %278  ;;  %218 = vst.msk [vmem:[%s521_s1] sm:$0xf] %vm217_vm1, %v254_v30  ;;  %v138_v1 = vmul.f32 %v122_v31, %v336_v6  ;;  %292 = vrsqrt.f32 %v99_v27  ;;  %v82_v33 = vpop.xlane.xlu1 %81 }
  0xa7   :  { %v79_v36 = vpop.xlane.xlu0 %78  ;;  %v281_v37 = vpop.eup %280  ;;  %v257_v38 = vpack.c.bf16 %v140_v0, %v140_v0  ;;  %v126_v39 = vmul.f32 1.4142135, %v279_v32  ;;  %v102_v42 = vmax.f32 %v82_v33, 1e-16 }
  0xa8   :  { %v101_v43 = vmax.f32 %v79_v36, 1e-16  ;;  %v255_v44 = vpack.c.bf16 %v138_v1, %v138_v1  ;;  %v125_v45 = vmul.f32 1.4142135, %v281_v37 }
  0xa9   :  { %221 = vst.msk [vmem:[%s521_s1 + $0xc] sm:$0xf] %vm217_vm1, %v257_v38  ;;  %v142_v2 = vmul.f32 %v126_v39, %v343_v8  ;;  %294 = vrsqrt.f32 %v102_v42 }
  0xaa   :  { %v283_v46 = vpop.eup %282  ;;  %219 = vst.msk [vmem:[%s521_s1 + $0x4] sm:$0xf] %vm217_vm1, %v255_v44  ;;  %v141_v6 = vmul.f32 %v125_v45, %v348_v9  ;;  %296 = vrsqrt.f32 %v101_v43  ;;  %v88_v47 = vpop.xlane.xlu1 %87 }
  0xab   :  { %v85_v48 = vpop.xlane.xlu0 %84  ;;  %v285_v49 = vpop.eup %284  ;;  %v259_v50 = vpack.c.bf16 %v142_v2, %v142_v2  ;;  %v128_v51 = vmul.f32 1.4142135, %v283_v46  ;;  %v104_v52 = vmax.f32 %v88_v47, 1e-16 }
  0xac   :  { %v103_v53 = vmax.f32 %v85_v48, 1e-16  ;;  %v258_v54 = vpack.c.bf16 %v141_v6, %v141_v6  ;;  %v127_v55 = vmul.f32 1.4142135, %v285_v49 }
  0xad   :  { %223 = vst.msk [vmem:[%s521_s1 + $0x14] sm:$0xf] %vm217_vm1, %v259_v50  ;;  %v144_v8 = vmul.f32 %v128_v51, %v361_v16  ;;  %298 = vrsqrt.f32 %v104_v52 }
  0xae   :  { %v287_v56 = vpop.eup %286  ;;  %222 = vst.msk [vmem:[%s521_s1 + $0x10] sm:$0xf] %vm217_vm1, %v258_v54  ;;  %v143_v9 = vmul.f32 %v127_v55, %v366_v17  ;;  %300 = vrsqrt.f32 %v103_v53 }
  0xaf   :  { %v289_v57 = vpop.eup %288  ;;  %v261_v58 = vpack.c.bf16 %v144_v8, %v144_v8  ;;  %v130_v59 = vmul.f32 1.4142135, %v287_v56 }
  0xb0   :  { %v260_v60 = vpack.c.bf16 %v143_v9, %v143_v9  ;;  %v129_v61 = vmul.f32 1.4142135, %v289_v57 }
  0xb1   :  { %225 = vst.msk [vmem:[%s521_s1 + $0x1c] sm:$0xf] %vm217_vm1, %v261_v58  ;;  %v146_v16 = vmul.f32 %v130_v59, %v377_v22 }
  0xb2   :  { %v291_v62 = vpop.eup %290  ;;  %224 = vst.msk [vmem:[%s521_s1 + $0x18] sm:$0xf] %vm217_vm1, %v260_v60  ;;  %v145_v17 = vmul.f32 %v129_v61, %v382_v23 }
  0xb3   :  { %v293_v63 = vpop.eup %292  ;;  %v263_v3 = vpack.c.bf16 %v146_v16, %v146_v16  ;;  %v132_v4 = vmul.f32 1.4142135, %v291_v62 }
  0xb4   :  { %v262_v5 = vpack.c.bf16 %v145_v17, %v145_v17  ;;  %v131_v7 = vmul.f32 1.4142135, %v293_v63 }
  0xb5   :  { %227 = vst.msk [vmem:[%s521_s1 + $0x24] sm:$0xf] %vm217_vm1, %v263_v3  ;;  %v148_v22 = vmul.f32 %v132_v4, %v393_v28 }
  0xb6   :  { %v295_v10 = vpop.eup %294  ;;  %226 = vst.msk [vmem:[%s521_s1 + $0x20] sm:$0xf] %vm217_vm1, %v262_v5  ;;  %v147_v23 = vmul.f32 %v131_v7, %v398_v29 }
  0xb7   :  { %v297_v11 = vpop.eup %296  ;;  %v265_v12 = vpack.c.bf16 %v148_v22, %v148_v22  ;;  %v134_v13 = vmul.f32 1.4142135, %v295_v10 }
  0xb8   :  { %v264_v14 = vpack.c.bf16 %v147_v23, %v147_v23  ;;  %v133_v15 = vmul.f32 1.4142135, %v297_v11 }
  0xb9   :  { %229 = vst.msk [vmem:[%s521_s1 + $0x2c] sm:$0xf] %vm217_vm1, %v265_v12  ;;  %v150_v28 = vmul.f32 %v134_v13, %v409_v34 }
  0xba   :  { %v299_v18 = vpop.eup %298  ;;  %228 = vst.msk [vmem:[%s521_s1 + $0x28] sm:$0xf] %vm217_vm1, %v264_v14  ;;  %v149_v29 = vmul.f32 %v133_v15, %v414_v35 }
  0xbb   :  { %v301_v19 = vpop.eup %300  ;;  %v267_v20 = vpack.c.bf16 %v150_v28, %v150_v28  ;;  %v136_v21 = vmul.f32 1.4142135, %v299_v18 }
  0xbc   :  { %v266_v24 = vpack.c.bf16 %v149_v29, %v149_v29  ;;  %v135_v25 = vmul.f32 1.4142135, %v301_v19 }
  0xbd   :  { %231 = vst.msk [vmem:[%s521_s1 + $0x34] sm:$0xf] %vm217_vm1, %v267_v20  ;;  %v152_v34 = vmul.f32 %v136_v21, %v425_v40 }
  0xbe   :  { %230 = vst.msk [vmem:[%s521_s1 + $0x30] sm:$0xf] %vm217_vm1, %v266_v24  ;;  %v151_v26 = vmul.f32 %v135_v25, %v430_v41 }
  0xbf   :  { %v269_v35 = vpack.c.bf16 %v152_v34, %v152_v34 }
  0xc0   :  { %v268_v27 = vpack.c.bf16 %v151_v26, %v151_v26 }
  0xc1   :  { %233 = vst.msk [vmem:[%s521_s1 + $0x3c] sm:$0xf] %vm217_vm1, %v269_v35 }
  0xc2   :  { %232 = vst.msk [vmem:[%s521_s1 + $0x38] sm:$0xf] %vm217_vm1, %v268_v27 }

// kernel: autoassociative_loss.5
= control target key start
LH: loop header
LB: loop body
LE: loop exit
PB: predicated region body
PF: predicated region fallthrough
CT: control target
= control target key end

     0   :  { %vm182_vm0 = vcmask 261120   ;;  %v328_v24 = vlaneseq  ;;  %v2494_v37 = vmov 0  ;;  %v2498_v42 = vmov 0  ;;  %s2457_s1 = inlined_call_operand.vmem [shape: bf16[128,32], index: 1, kind: input, shape index: {}, may-alias: {0,1}]   ;;  %s2458_s0 = inlined_call_operand.vmem [shape: bf16[128,32], index: 0, kind: input, shape index: {}, may-alias: {0,1}]   ;;  %s2459_s2 = inlined_call_operand.vmem [shape: f32[128,1], index: 2, kind: output, shape index: {}]  }
   0x1   :  { %v1455_v0 = vld [vmem:[%s2457_s1 + $0x38] sm:$0xff]   ;;  %v1456_v1 = vld [vmem:[%s2457_s1 + $0x30] sm:$0xff]   ;;  %v1457_v3 = vld [vmem:[%s2457_s1 + $0x28] sm:$0xff]   ;;  %v2502_v47 = vmov 0  ;;  %v2506_v49 = vmov 0  ;;  %v2510_v59 = vmov 0 }
   0x2   :  { %1434 = vmatprep.subr.msk.bf16.mxu0 %vm182_vm0, %v1455_v0  ;;  %1435 = vmatprep.subr.msk.bf16.mxu1 %vm182_vm0, %v1455_v0  ;;  %v229_v2 = vsel %vm182_vm0, %v1455_v0, 0  ;;  %v226_v4 = vsel %vm182_vm0, %v1456_v1, 0  ;;  %v1463_v5 = vld [vmem:[%s2458_s0] sm:$0xff]   ;;  %v223_v7 = vsel %vm182_vm0, %v1457_v3, 0  ;;  %v1459_v10 = vld [vmem:[%s2457_s1 + $0x18] sm:$0xff]   ;;  %v1460_v12 = vld [vmem:[%s2457_s1 + $0x10] sm:$0xff]  }
   0x3   :  { %1387 = vmatpush3.bf16.xpose.msra.mxu0 %v229_v2  ;;  %1426 = vmatpush3.bf16.xpose.msra.mxu1 %v229_v2  ;;  %v1464_v6 = vld [vmem:[%s2458_s0 + $0x20] sm:$0xff]   ;;  %v217_v11 = vsel %vm182_vm0, %v1459_v10, 0  ;;  %v214_v13 = vsel %vm182_vm0, %v1460_v12, 0  ;;  %v1461_v14 = vld [vmem:[%s2457_s1 + $0x8] sm:$0xff]   ;;  %v1467_v20 = vld [vmem:[%s2458_s0 + $0x10] sm:$0xff]   ;;  %v1665_v25 = vshrl.u32 %v328_v24, 7 }
   0x4   :  { %1436 = vmatprep.subr.msk.bf16.mxu0 %vm182_vm0, %v1456_v1  ;;  %1437 = vmatprep.subr.msk.bf16.mxu1 %vm182_vm0, %v1456_v1  ;;  %v1458_v8 = vld [vmem:[%s2457_s1 + $0x20] sm:$0xff]   ;;  %v211_v15 = vsel %vm182_vm0, %v1461_v14, 0  ;;  %v1465_v18 = vld [vmem:[%s2458_s0 + $0x8] sm:$0xff]   ;;  %v1469_v21 = vld [vmem:[%s2458_s0 + $0x30] sm:$0xff]   ;;  %v1673_v28 = vand.u32 127, %v328_v24  ;;  %v2512_v60 = vmov 0 }
   0x5   :  { %1402 = vmatprep.mubr.msk.bf16.mxu0 %vm182_vm0, %v1463_v5  ;;  %1410 = vmatprep.mubr.msk.bf16.mxu1 %vm182_vm0, %v1464_v6  ;;  %v220_v9 = vsel %vm182_vm0, %v1458_v8, 0  ;;  %v1462_v16 = vld [vmem:[%s2457_s1] sm:$0xff]   ;;  %v1466_v19 = vld [vmem:[%s2458_s0 + $0x28] sm:$0xff]   ;;  %v1468_v22 = vld [vmem:[%s2458_s0 + $0x18] sm:$0xff]   ;;  %v1668_v26 = vadd.s32 80, %v1665_v25  ;;  %v1671_v27 = vadd.s32 16, %v1665_v25 }
   0x6   :  { %v208_v17 = vsel %vm182_vm0, %v1462_v16, 0  ;;  %v1470_v23 = vld [vmem:[%s2458_s0 + $0x38] sm:$0xff]   ;;  %v1676_v29 = vadd.s32 64, %v1665_v25  ;;  %v1681_v32 = vadd.s32 24, %v1665_v25  ;;  %v1684_v33 = vadd.s32 88, %v1665_v25 }
   0x7   :  { %v729_v30 = vxor.u32 1, %v1671_v27  ;;  %v737_v31 = vxor.u32 1, %v1668_v26  ;;  %v727_v34 = vxor.u32 1, %v1665_v25  ;;  %v1699_v38 = vadd.s32 72, %v1665_v25 }
   0x8   :  { %v735_v36 = vxor.u32 1, %v1676_v29  ;;  %v1702_v39 = vadd.s32 8, %v1665_v25  ;;  %v730_v41 = vxor.u32 1, %v1681_v32  ;;  %v738_v43 = vxor.u32 1, %v1684_v33 }
   0x9   :  { %vm1688_vm1 = vcmp.eq.s32.totalorder %v1673_v28, %v729_v30  ;;  %vm1694_vm2 = vcmp.eq.s32.totalorder %v1673_v28, %v737_v31  ;;  %vm1705_vm3 = vcmp.eq.s32.totalorder %v1673_v28, %v727_v34  ;;  %v736_v46 = vxor.u32 1, %v1699_v38 }
   0xa   :  { %v2495_v37 = vsel %vm1694_vm2, 4294967295, %v2494_v37  ;;  %vm1711_vm4 = vcmp.eq.s32.totalorder %v1673_v28, %v735_v36  ;;  %v728_v44 = vxor.u32 1, %v1702_v39  ;;  %vm1718_vm5 = vcmp.eq.s32.totalorder %v1673_v28, %v730_v41 }
   0xb   :  { %1389 = vmatpush3.bf16.xpose.msra.mxu0 %v226_v4  ;;  %1427 = vmatpush3.bf16.xpose.msra.mxu1 %v226_v4  ;;  %v2499_v42 = vsel %vm1711_vm4, 4294967295, %v2498_v42  ;;  %vm1724_vm6 = vcmp.eq.s32.totalorder %v1673_v28, %v738_v43  ;;  %vm1734_vm8 = vcmp.eq.s32.totalorder %v1673_v28, %v736_v46  ;;  %v1739_v50 = vadd.s32 32, %v1665_v25 }
   0xc   :  { %1438 = vmatprep.subr.msk.bf16.mxu0 %vm182_vm0, %v1457_v3  ;;  %1439 = vmatprep.subr.msk.bf16.mxu1 %vm182_vm0, %v1457_v3  ;;  %v2503_v47 = vsel %vm1724_vm6, 4294967295, %v2502_v47  ;;  %vm1729_vm7 = vcmp.eq.s32.totalorder %v1673_v28, %v728_v44  ;;  %v2507_v49 = vsel %vm1734_vm8, 4294967295, %v2506_v49  ;;  %v1742_v51 = vadd.s32 40, %v1665_v25 }
   0xd   :  { %v1745_v52 = vadd.s32 48, %v1665_v25  ;;  %v1748_v53 = vadd.s32 56, %v1665_v25  ;;  %v731_v54 = vxor.u32 1, %v1739_v50  ;;  %v2514_v61 = vmov 0 }
   0xe   :  { %v732_v55 = vxor.u32 1, %v1742_v51  ;;  %v1775_v62 = vadd.s32 96, %v1665_v25  ;;  %v1778_v63 = vadd.s32 112, %v1665_v25  ;;  %v1781_v0 = vadd.s32 104, %v1665_v25 }
   0xf   :  { %v734_v56 = vxor.u32 1, %v1748_v53  ;;  %v733_v57 = vxor.u32 1, %v1745_v52  ;;  %vm1755_vm9 = vcmp.eq.s32.totalorder %v1673_v28, %v731_v54  ;;  %v1784_v1 = vadd.s32 120, %v1665_v25 }
  0x10   :  { %vm1760_vm10 = vcmp.eq.s32.totalorder %v1673_v28, %v732_v55  ;;  %v740_v2 = vxor.u32 1, %v1781_v0  ;;  %v739_v3 = vxor.u32 1, %v1775_v62  ;;  %v741_v5 = vxor.u32 1, %v1778_v63 }
  0x11   :  { %v2511_v59 = vsel %vm1760_vm10, 4294967295, %v2510_v59  ;;  %vm1765_vm11 = vcmp.eq.s32.totalorder %v1673_v28, %v734_v56  ;;  %vm1770_vm12 = vcmp.eq.s32.totalorder %v1673_v28, %v733_v57  ;;  %v742_v4 = vxor.u32 1, %v1784_v1 }
  0x12   :  { %v2513_v60 = vsel %vm1765_vm11, 4294967295, %v2512_v60  ;;  %v2515_v61 = vsel %vm1770_vm12, 4294967295, %v2514_v61  ;;  %vm1791_vm13 = vcmp.eq.s32.totalorder %v1673_v28, %v740_v2  ;;  %v2516_v6 = vmov 0 }
  0x13   :  { %1391 = vmatpush3.bf16.xpose.msra.mxu0 %v223_v7  ;;  %1428 = vmatpush3.bf16.xpose.msra.mxu1 %v223_v7  ;;  %v2517_v6 = vsel %vm1791_vm13, 4294967295, %v2516_v6  ;;  %vm1796_vm14 = vcmp.eq.s32.totalorder %v1673_v28, %v739_v3  ;;  %v2518_v7 = vmov 0  ;;  %vm1801_vm15 = vcmp.eq.s32.totalorder %v1673_v28, %v742_v4 }
  0x14   :  { %1440 = vmatprep.subr.msk.bf16.mxu0 %vm182_vm0, %v1458_v8  ;;  %1441 = vmatprep.subr.msk.bf16.mxu1 %vm182_vm0, %v1458_v8  ;;  %v2519_v7 = vsel %vm1796_vm14, 4294967295, %v2518_v7  ;;  %v2520_v8 = vmov 0  ;;  %vm2464_vm10 = vcmask 7168   ;;  %vm332_vm13 = vcmp.ge.s32.totalorder %v1673_v28, 8 }
  0x15   :  { %v2521_v8 = vsel %vm1801_vm15, 4294967295, %v2520_v8  ;;  %vm834_vm15 = vcmp.eq.s32.totalorder %v1668_v26, %v1673_v28  ;;  %vm826_vm11 = vcmp.eq.s32.totalorder %v1671_v27, %v1673_v28  ;;  %vm829_vm14 = vcmp.eq.s32.totalorder %v1742_v51, %v1673_v28 }
  0x1b   :  { %1393 = vmatpush3.bf16.xpose.msra.mxu0 %v220_v9  ;;  %1429 = vmatpush3.bf16.xpose.msra.mxu1 %v220_v9  ;;  %v2522_v9 = vmov 0 }
  0x1c   :  { %1442 = vmatprep.subr.msk.bf16.mxu0 %vm182_vm0, %v1459_v10  ;;  %1443 = vmatprep.subr.msk.bf16.mxu1 %vm182_vm0, %v1459_v10  ;;  %v1567_v10 = vmov -1e+30  }
  0x1d   :  { %27 = vst.msk [vmem:[#allocation2 + $0x50] sm:$0xff] %vm2464_vm10, %v1567_v10  ;;  %17 = vst.msk [vmem:[#allocation2] sm:$0xff] %vm2464_vm10, %v1567_v10 }
  0x1e   :  { %18 = vst.msk [vmem:[#allocation2 + $0x8] sm:$0xff] %vm2464_vm10, %v1567_v10  ;;  %19 = vst.msk [vmem:[#allocation2 + $0x10] sm:$0xff] %vm2464_vm10, %v1567_v10 }
  0x1f   :  { %20 = vst.msk [vmem:[#allocation2 + $0x18] sm:$0xff] %vm2464_vm10, %v1567_v10  ;;  %21 = vst.msk [vmem:[#allocation2 + $0x20] sm:$0xff] %vm2464_vm10, %v1567_v10 }
  0x20   :  { %22 = vst.msk [vmem:[#allocation2 + $0x28] sm:$0xff] %vm2464_vm10, %v1567_v10  ;;  %23 = vst.msk [vmem:[#allocation2 + $0x30] sm:$0xff] %vm2464_vm10, %v1567_v10 }
  0x21   :  { %24 = vst.msk [vmem:[#allocation2 + $0x38] sm:$0xff] %vm2464_vm10, %v1567_v10  ;;  %25 = vst.msk [vmem:[#allocation2 + $0x40] sm:$0xff] %vm2464_vm10, %v1567_v10 }
  0x22   :  { %26 = vst.msk [vmem:[#allocation2 + $0x48] sm:$0xff] %vm2464_vm10, %v1567_v10  ;;  %28 = vst.msk [vmem:[#allocation2 + $0x58] sm:$0xff] %vm2464_vm10, %v1567_v10 }
  0x23   :  { %1395 = vmatpush3.bf16.xpose.msra.mxu0 %v217_v11  ;;  %1430 = vmatpush3.bf16.xpose.msra.mxu1 %v217_v11  ;;  %29 = vst.msk [vmem:[#allocation2 + $0x60] sm:$0xff] %vm2464_vm10, %v1567_v10  ;;  %30 = vst.msk [vmem:[#allocation2 + $0x68] sm:$0xff] %vm2464_vm10, %v1567_v10 }
  0x24   :  { %1444 = vmatprep.subr.msk.bf16.mxu0 %vm182_vm0, %v1460_v12  ;;  %1445 = vmatprep.subr.msk.bf16.mxu1 %vm182_vm0, %v1460_v12  ;;  %31 = vst.msk [vmem:[#allocation2 + $0x70] sm:$0xff] %vm2464_vm10, %v1567_v10  ;;  %32 = vst.msk [vmem:[#allocation2 + $0x78] sm:$0xff] %vm2464_vm10, %v1567_v10  ;;  %vm833_vm10 = vcmp.eq.s32.totalorder %v1699_v38, %v1673_v28 }
  0x26   :  { %v2085_v57 = vld [vmem:[#allocation2 + $0x18] sm:$0xff] }
  0x27   :  { %2561 = vst [vmem:[#allocation8_spill] sm:$0xff] %v2085_v57 }
  0x28   :  { %v2102_v10 = vld [vmem:[#allocation2 + $0x40] sm:$0xff] }
  0x29   :  { %2566 = vst [vmem:[#allocation11_spill] sm:$0xff] %v2102_v10  ;;  %v2104_v56 = vld [vmem:[#allocation2 + $0x58] sm:$0xff]  ;;  %v2122_v26 = vld [vmem:[#allocation2 + $0x48] sm:$0xff] }
  0x2a   :  { %2567 = vst [vmem:[#allocation12_spill] sm:$0xff] %v2104_v56  ;;  %2572 = vst [vmem:[#allocation15_spill] sm:$0xff] %v2122_v26 }
  0x2b   :  { %1397 = vmatpush3.bf16.xpose.msra.mxu0 %v214_v13  ;;  %1431 = vmatpush3.bf16.xpose.msra.mxu1 %v214_v13 }
  0x2c   :  { %1446 = vmatprep.subr.msk.bf16.mxu0 %vm182_vm0, %v1461_v14  ;;  %1447 = vmatprep.subr.msk.bf16.mxu1 %vm182_vm0, %v1461_v14 }
  0x33   :  { %1399 = vmatpush3.bf16.xpose.msra.mxu0 %v211_v15  ;;  %1432 = vmatpush3.bf16.xpose.msra.mxu1 %v211_v15 }
  0x34   :  { %1448 = vmatprep.subr.msk.bf16.mxu0 %vm182_vm0, %v1462_v16  ;;  %1449 = vmatprep.subr.msk.bf16.mxu1 %vm182_vm0, %v1462_v16 }
  0x3b   :  { %1401 = vmatpush3.bf16.xpose.msra.mxu0 %v208_v17  ;;  %1433 = vmatpush3.bf16.xpose.msra.mxu1 %v208_v17 }
  0x42   :  { %1403 = vmatmul.mubr.msk.bf16.vlgmr.msra.gmra.mxu0 %vm182_vm0, %v1465_v18  ;;  %1411 = vmatmul.mubr.msk.bf16.vlgmr.msra.gmra.mxu1 %vm182_vm0, %v1466_v19 }
  0x43   :  { %1406 = vmatprep.mubr.msk.bf16.mxu0 %vm182_vm0, %v1467_v20  ;;  %1414 = vmatprep.mubr.msk.bf16.mxu1 %vm182_vm0, %v1469_v21  ;;  %v1568_v20 = vmov 0  }
  0x44   :  { %1453 = vset.pattern.permute.xlu1 %v1568_v20  ;;  %1454 = vset.pattern.permute.xlu0 %v1568_v20 }
  0x4a   :  { %1407 = vmatmul.mubr.msk.bf16.gmra.mxu0 %vm182_vm0, %v1468_v22  ;;  %1415 = vmatmul.mubr.msk.bf16.gmra.mxu1 %vm182_vm0, %v1470_v23  ;;  %vm1806_vm0 = vcmp.eq.s32.totalorder %v1673_v28, %v741_v5 }
  0x4b   :  { %v2523_v9 = vsel %vm1806_vm0, 4294967295, %v2522_v9  ;;  %vm831_vm0 = vcmp.eq.s32.totalorder %v1748_v53, %v1673_v28 }
 0x102   :  { %v1404_v11 = vpop.f32.mrf.mxu0  ;;  %v1412_v12 = vpop.f32.mrf.mxu1 }
 0x103   :  { %v1833_v13 = vsel %vm332_vm13, -1e+30, %v1404_v11  ;;  %v1837_v14 = vsel %vm332_vm13, -1e+30, %v1412_v12 }
 0x104   :  { %v265_v15 = vpop.f32.mrf.mxu0  ;;  %v297_v16 = vpop.f32.mrf.mxu1  ;;  %v1840_v17 = vsel %vm834_vm15, -1e+30, %v1837_v14  ;;  %v1843_v18 = vsel %vm826_vm11, -1e+30, %v1833_v13  ;;  %vm824_vm11 = vcmp.eq.s32.totalorder %v1665_v25, %v1673_v28  ;;  %vm827_vm15 = vcmp.eq.s32.totalorder %v1681_v32, %v1673_v28 }
 0x105   :  { %v1853_v21 = vsel %vm332_vm13, -1e+30, %v265_v15  ;;  %v1857_v22 = vsel %vm332_vm13, -1e+30, %v297_v16  ;;  %892 = vmax.xlane.f32.xlu0 %v1840_v17  ;;  %876 = vmax.xlane.f32.xlu1 %v1843_v18 }
 0x106   :  { %v1405_v23 = vpop.f32.mrf.mxu0  ;;  %v1413_v24 = vpop.f32.mrf.mxu1  ;;  %v1880_v34 = vsel %vm824_vm11, -1e+30, %v1853_v21  ;;  %vm832_vm11 = vcmp.eq.s32.totalorder %v1676_v29, %v1673_v28 }
 0x107   :  { %v1873_v30 = vsel %vm332_vm13, -1e+30, %v1405_v23  ;;  %v1877_v25 = vsel %vm332_vm13, -1e+30, %v1413_v24 }
 0x108   :  { %v268_v31 = vpop.f32.mrf.mxu0  ;;  %v300_v32 = vpop.f32.mrf.mxu1  ;;  %v1883_v36 = vsel %vm827_vm15, -1e+30, %v1873_v30  ;;  %vm835_vm15 = vcmp.eq.s32.totalorder %v1684_v33, %v1673_v28  ;;  %v1922_v33 = vsel %vm832_vm11, -1e+30, %v1857_v22  ;;  %vm825_vm11 = vcmp.eq.s32.totalorder %v1702_v39, %v1673_v28 }
 0x109   :  { %v1893_v44 = vsel %vm332_vm13, -1e+30, %v268_v31  ;;  %v1897_v46 = vsel %vm332_vm13, -1e+30, %v300_v32  ;;  %872 = vmax.xlane.f32.xlu0 %v1880_v34  ;;  %878 = vmax.xlane.f32.xlu1 %v1883_v36  ;;  %v1925_v3 = vsel %vm835_vm15, -1e+30, %v1877_v25  ;;  %vm830_vm15 = vcmp.eq.s32.totalorder %v1745_v52, %v1673_v28 }
 0x10a   :  { %v1408_v54 = vpop.f32.mrf.mxu0  ;;  %v1416_v55 = vpop.f32.mrf.mxu1  ;;  %v1954_v31 = vsel %vm833_vm10, -1e+30, %v1897_v46  ;;  %v2597_v40 = vsel %vm1718_vm5, %v1873_v30, 0.0  ;;  %vm2602_vm5 = vnez %v2515_v61 }
 0x10b   :  { %v1913_v2 = vsel %vm332_vm13, -1e+30, %v1408_v54  ;;  %v1919_v29 = vsel %vm332_vm13, -1e+30, %v1416_v55  ;;  %v1966_v54 = vsel %vm825_vm11, -1e+30, %v1893_v44  ;;  %vm828_vm11 = vcmp.eq.s32.totalorder %v1739_v50, %v1673_v28 }
 0x10c   :  { %v281_v4 = vpop.f32.mrf.mxu0  ;;  %v313_v5 = vpop.f32.mrf.mxu1  ;;  %v1992_v11 = vsel %vm830_vm15, -1e+30, %v1913_v2  ;;  %vm839_vm15 = vcmp.eq.s32.totalorder %v1784_v1, %v1673_v28 }
 0x10d   :  { %888 = vmax.xlane.f32.xlu0 %v1922_v33  ;;  %894 = vmax.xlane.f32.xlu1 %v1925_v3  ;;  %v1937_v12 = vsel %vm332_vm13, -1e+30, %v281_v4  ;;  %v1943_v16 = vsel %vm332_vm13, -1e+30, %v313_v5 }
 0x10e   :  { %v1409_v15 = vpop.f32.mrf.mxu0  ;;  %v1417_v23 = vpop.f32.mrf.mxu1  ;;  %v2010_v52 = vsel %vm828_vm11, -1e+30, %v1937_v12  ;;  %vm2528_vm11 = vcmask 7168  }
 0x10f   :  { %v1958_v39 = vsel %vm332_vm13, -1e+30, %v1409_v15  ;;  %v1970_v38 = vsel %vm332_vm13, -1e+30, %v1417_v23  ;;  %v1569_v23 = vmov 0.0   ;;  %vm2530_vm2 = vmmov %vm2528_vm11 }
 0x110   :  { %v284_v55 = vpop.f32.mrf.mxu0  ;;  %v316_v4 = vpop.f32.mrf.mxu1  ;;  %v1995_v32 = vsel %vm831_vm0, -1e+30, %v1958_v39  ;;  %v2013_v20 = vsel %vm839_vm15, -1e+30, %v1970_v38  ;;  %vm836_vm0 = vcmp.eq.s32.totalorder %v1775_v62, %v1673_v28  ;;  %49 = vst.msk [vmem:[#allocation4] sm:$0xff] %vm2528_vm11, %v1569_v23  ;;  %vm2529_vm15 = vmmov %vm2528_vm11 }
 0x111   :  { %890 = vmax.xlane.f32.xlu1 %v1954_v31  ;;  %874 = vmax.xlane.f32.xlu0 %v1966_v54  ;;  %v1979_v53 = vsel %vm332_vm13, -1e+30, %v284_v55  ;;  %v1983_v15 = vsel %vm332_vm13, -1e+30, %v316_v4  ;;  %v2022_v50 = vsel %vm836_vm0, -1e+30, %v1943_v16  ;;  %vm2531_vm6 = vmmov %vm2530_vm2 }
 0x112   :  { %v2025_v1 = vsel %vm829_vm14, -1e+30, %v1979_v53  ;;  %33 = vst.msk [vmem:[#allocation3] sm:$0xff] %vm2529_vm15, %v1569_v23  ;;  %vm2532_vm4 = vmmov %vm2530_vm2  ;;  %v2075_v4 = vld [vmem:[#allocation2 + $0x10] sm:$0xff] }
 0x113   :  { %34 = vst.msk [vmem:[#allocation3 + $0x8] sm:$0xff] %vm2530_vm2, %v1569_v23  ;;  %vm2533_vm8 = vmmov %vm2530_vm2 }
 0x114   :  { %35 = vst.msk [vmem:[#allocation3 + $0x10] sm:$0xff] %vm2531_vm6, %v1569_v23  ;;  %vm2534_vm12 = vmmov %vm2530_vm2 }
 0x115   :  { %884 = vmax.xlane.f32.xlu0 %v1992_v11  ;;  %886 = vmax.xlane.f32.xlu1 %v1995_v32  ;;  %36 = vst.msk [vmem:[#allocation3 + $0x18] sm:$0xff] %vm2532_vm4, %v1569_v23  ;;  %vm2535_vm0 = vmmov %vm2530_vm2 }
 0x116   :  { %37 = vst.msk [vmem:[#allocation3 + $0x20] sm:$0xff] %vm2533_vm8, %v1569_v23  ;;  %vm2536_vm10 = vmmov %vm2535_vm0 }
 0x117   :  { %38 = vst.msk [vmem:[#allocation3 + $0x28] sm:$0xff] %vm2534_vm12, %v1569_v23  ;;  %vm2537_vm14 = vmmov %vm2535_vm0 }
 0x118   :  { %39 = vst.msk [vmem:[#allocation3 + $0x30] sm:$0xff] %vm2535_vm0, %v1569_v23  ;;  %vm2538_vm13 = vmmov %vm2535_vm0 }
 0x119   :  { %880 = vmax.xlane.f32.xlu0 %v2010_v52  ;;  %902 = vmax.xlane.f32.xlu1 %v2013_v20  ;;  %40 = vst.msk [vmem:[#allocation3 + $0x38] sm:$0xff] %vm2536_vm10, %v1569_v23  ;;  %vm2539_vm11 = vmmov %vm2535_vm0 }
 0x11a   :  { %41 = vst.msk [vmem:[#allocation3 + $0x40] sm:$0xff] %vm2537_vm14, %v1569_v23  ;;  %vm2540_vm15 = vmmov %vm2535_vm0 }
 0x11b   :  { %42 = vst.msk [vmem:[#allocation3 + $0x48] sm:$0xff] %vm2538_vm13, %v1569_v23  ;;  %vm2541_vm2 = vmmov %vm2535_vm0 }
 0x11c   :  { %43 = vst.msk [vmem:[#allocation3 + $0x50] sm:$0xff] %vm2539_vm11, %v1569_v23  ;;  %vm2542_vm6 = vmmov %vm2535_vm0 }
 0x11d   :  { %44 = vst.msk [vmem:[#allocation3 + $0x58] sm:$0xff] %vm2540_vm15, %v1569_v23  ;;  %vm2543_vm4 = vmmov %vm2535_vm0  ;;  %896 = vmax.xlane.f32.xlu0 %v2022_v50  ;;  %882 = vmax.xlane.f32.xlu1 %v2025_v1 }
 0x11e   :  { %45 = vst.msk [vmem:[#allocation3 + $0x60] sm:$0xff] %vm2541_vm2, %v1569_v23  ;;  %vm2544_vm8 = vmmov %vm2535_vm0 }
 0x11f   :  { %46 = vst.msk [vmem:[#allocation3 + $0x68] sm:$0xff] %vm2542_vm6, %v1569_v23  ;;  %vm2545_vm12 = vmmov %vm2535_vm0 }
 0x120   :  { %47 = vst.msk [vmem:[#allocation3 + $0x70] sm:$0xff] %vm2543_vm4, %v1569_v23  ;;  %vm2546_vm10 = vmmov %vm2535_vm0 }
 0x121   :  { %48 = vst.msk [vmem:[#allocation3 + $0x78] sm:$0xff] %vm2544_vm8, %v1569_v23  ;;  %vm2547_vm14 = vmmov %vm2535_vm0 }
 0x122   :  { %50 = vst.msk [vmem:[#allocation4 + $0x8] sm:$0xff] %vm2545_vm12, %v1569_v23  ;;  %vm2548_vm13 = vmmov %vm2535_vm0 }
 0x123   :  { %51 = vst.msk [vmem:[#allocation4 + $0x10] sm:$0xff] %vm2535_vm0, %v1569_v23  ;;  %vm2549_vm11 = vmmov %vm2535_vm0 }
 0x124   :  { %52 = vst.msk [vmem:[#allocation4 + $0x18] sm:$0xff] %vm2546_vm10, %v1569_v23  ;;  %vm2550_vm15 = vmmov %vm2535_vm0 }
 0x125   :  { %53 = vst.msk [vmem:[#allocation4 + $0x20] sm:$0xff] %vm2547_vm14, %v1569_v23  ;;  %vm2551_vm2 = vmmov %vm2535_vm0 }
 0x126   :  { %54 = vst.msk [vmem:[#allocation4 + $0x28] sm:$0xff] %vm2548_vm13, %v1569_v23  ;;  %vm2552_vm6 = vmmov %vm2535_vm0  ;;  %vm838_vm13 = vcmp.eq.s32.totalorder %v1778_v63, %v1673_v28 }
 0x127   :  { %55 = vst.msk [vmem:[#allocation4 + $0x30] sm:$0xff] %vm2549_vm11, %v1569_v23  ;;  %vm2553_vm4 = vmmov %vm2535_vm0  ;;  %vm837_vm11 = vcmp.eq.s32.totalorder %v1781_v0, %v1673_v28  ;;  %v2066_v51 = vsel %vm838_vm13, -1e+30, %v1919_v29  ;;  %v2083_v0 = vld [vmem:[#allocation2] sm:$0xff] }
 0x128   :  { %56 = vst.msk [vmem:[#allocation4 + $0x38] sm:$0xff] %vm2550_vm15, %v1569_v23  ;;  %vm2554_vm8 = vmmov %vm2535_vm0  ;;  %v2069_v62 = vsel %vm837_vm11, -1e+30, %v1983_v15  ;;  %900 = vmax.xlane.f32.xlu0 %v2066_v51 }
 0x129   :  { %57 = vst.msk [vmem:[#allocation4 + $0x40] sm:$0xff] %vm2551_vm2, %v1569_v23  ;;  %vm2555_vm12 = vmmov %vm2535_vm0  ;;  %898 = vmax.xlane.f32.xlu1 %v2069_v62 }
 0x12a   :  { %58 = vst.msk [vmem:[#allocation4 + $0x48] sm:$0xff] %vm2552_vm6, %v1569_v23  ;;  %vm2556_vm10 = vmmov %vm2535_vm0 }
 0x12b   :  { %59 = vst.msk [vmem:[#allocation4 + $0x50] sm:$0xff] %vm2553_vm4, %v1569_v23  ;;  %vm2557_vm14 = vmmov %vm2535_vm0 }
 0x12c   :  { %60 = vst.msk [vmem:[#allocation4 + $0x58] sm:$0xff] %vm2554_vm8, %v1569_v23  ;;  %2560 = vst [vmem:[#allocation7_spill] sm:$0xff] %v2083_v0 }
 0x12d   :  { %61 = vst.msk [vmem:[#allocation4 + $0x60] sm:$0xff] %vm2555_vm12, %v1569_v23  ;;  %vm2562_vm15 = vmmov %vm2535_vm0 }
 0x12e   :  { %62 = vst.msk [vmem:[#allocation4 + $0x68] sm:$0xff] %vm2535_vm0, %v1569_v23  ;;  %vm2563_vm2 = vmmov %vm2535_vm0 }
 0x12f   :  { %63 = vst.msk [vmem:[#allocation4 + $0x70] sm:$0xff] %vm2556_vm10, %v1569_v23  ;;  %vm2568_vm6 = vmmov %vm2535_vm0 }
 0x130   :  { %64 = vst.msk [vmem:[#allocation4 + $0x78] sm:$0xff] %vm2557_vm14, %v1569_v23  ;;  %v2073_v23 = vld [vmem:[#allocation2 + $0x50] sm:$0xff]  ;;  %vm2569_vm4 = vmmov %vm2535_vm0 }
 0x131   :  { %2558 = vst [vmem:[#allocation5_spill] sm:$0xff] %v2073_v23  ;;  %vm2574_vm8 = vmmov %vm2535_vm0 }
 0x132   :  { %vm2575_vm12 = vmmov %vm2535_vm0 }
 0x133   :  { %vm2580_vm10 = vmmov %vm2535_vm0 }
 0x134   :  { %vm2584_vm14 = vmmov %vm2535_vm0 }
 0x135   :  { %vm2585_vm13 = vmmov %vm2535_vm0 }
 0x136   :  { %vm2587_vm11 = vmmov %vm2535_vm0 }
 0x18e   :  { %v893_v43 = vpop.xlane.xlu0 %892  ;;  %v877_v27 = vpop.xlane.xlu1 %876 }
 0x18f   :  { %v2078_v63 = vmax.f32 %v2073_v23, %v893_v43  ;;  %v2081_v28 = vmax.f32 %v2075_v4, %v877_v27  ;;  %v2124_v23 = vld [vmem:[#allocation2 + $0x8] sm:$0xff] }
 0x190   :  { %2573 = vst [vmem:[#allocation16_spill] sm:$0xff] %v2124_v23 }
 0x191   :  { %2559 = vst [vmem:[#allocation6_spill] sm:$0xff] %v2078_v63  ;;  %1202 = vst.msk [vmem:[#allocation2 + $0x50] sm:$0xff] %vm2562_vm15, %v2078_v63  ;;  %1012 = vperm.xlu1 %1453, %v2081_v28  }
 0x192   :  { %1194 = vst.msk [vmem:[#allocation2 + $0x10] sm:$0xff] %vm2563_vm2, %v2081_v28  ;;  %v873_v27 = vpop.xlane.xlu0 %872  ;;  %v879_v43 = vpop.xlane.xlu1 %878  ;;  %vm2588_vm15 = vmmov %vm2535_vm0 }
 0x193   :  { %v2097_v55 = vmax.f32 %v2083_v0, %v873_v27  ;;  %v2100_v41 = vmax.f32 %v2085_v57, %v879_v43  ;;  %v2203_v0 = vld [vmem:[#allocation2 + $0x68] sm:$0xff]  ;;  %vm2589_vm2 = vmmov %vm2535_vm0 }
 0x195   :  { %2564 = vst [vmem:[#allocation9_spill] sm:$0xff] %v2097_v55  ;;  %2565 = vst [vmem:[#allocation10_spill] sm:$0xff] %v2100_v41  ;;  %1002 = vperm.xlu0 %1454, %v2097_v55   ;;  %1052 = vperm.xlu1 %1453, %v2078_v63  }
 0x196   :  { %1192 = vst.msk [vmem:[#allocation2] sm:$0xff] %vm2568_vm6, %v2097_v55  ;;  %v889_v27 = vpop.xlane.xlu0 %888  ;;  %v895_v43 = vpop.xlane.xlu1 %894  ;;  %v2144_v55 = vld [vmem:[#allocation2 + $0x38] sm:$0xff]  ;;  %vm2590_vm6 = vmmov %vm2535_vm0 }
 0x197   :  { %1195 = vst.msk [vmem:[#allocation2 + $0x18] sm:$0xff] %vm2569_vm4, %v2100_v41  ;;  %v2117_v19 = vmax.f32 %v2102_v10, %v889_v27  ;;  %v2120_v5 = vmax.f32 %v2104_v56, %v895_v43  ;;  %v2142_v10 = vld [vmem:[#allocation2 + $0x30] sm:$0xff]  ;;  %2579 = vst [vmem:[#allocation20_spill] sm:$0xff] %v2144_v55 }
 0x198   :  { %2578 = vst [vmem:[#allocation19_spill] sm:$0xff] %v2142_v10  ;;  %vm2591_vm4 = vmmov %vm2535_vm0 }
 0x199   :  { %2570 = vst [vmem:[#allocation13_spill] sm:$0xff] %v2117_v19  ;;  %2571 = vst [vmem:[#allocation14_spill] sm:$0xff] %v2120_v5  ;;  %1057 = vperm.xlu0 %1454, %v2120_v5   ;;  %1042 = vperm.xlu1 %1453, %v2117_v19  }
 0x19a   :  { %1200 = vst.msk [vmem:[#allocation2 + $0x40] sm:$0xff] %vm2574_vm8, %v2117_v19  ;;  %v891_v27 = vpop.xlane.xlu1 %890  ;;  %v875_v43 = vpop.xlane.xlu0 %874  ;;  %v2164_v19 = vld [vmem:[#allocation2 + $0x78] sm:$0xff]  ;;  %vm2592_vm8 = vmmov %vm2535_vm0 }
 0x19b   :  { %1203 = vst.msk [vmem:[#allocation2 + $0x58] sm:$0xff] %vm2575_vm12, %v2120_v5  ;;  %v2137_v63 = vmax.f32 %v2122_v26, %v891_v27  ;;  %v2140_v24 = vmax.f32 %v2124_v23, %v875_v43  ;;  %v2162_v26 = vld [vmem:[#allocation2 + $0x20] sm:$0xff]  ;;  %2583 = vst [vmem:[#allocation23_spill] sm:$0xff] %v2164_v19  ;;  %vm2607_vm12 = vnez %v2499_v42 }
 0x19c   :  { %2582 = vst [vmem:[#allocation22_spill] sm:$0xff] %v2162_v26  ;;  %v2181_v5 = vld [vmem:[#allocation2 + $0x60] sm:$0xff] }
 0x19d   :  { %2576 = vst [vmem:[#allocation17_spill] sm:$0xff] %v2137_v63  ;;  %2577 = vst [vmem:[#allocation18_spill] sm:$0xff] %v2140_v24  ;;  %1047 = vperm.xlu0 %1454, %v2137_v63   ;;  %1017 = vperm.xlu1 %1453, %v2100_v41  }
 0x19e   :  { %1201 = vst.msk [vmem:[#allocation2 + $0x48] sm:$0xff] %vm2535_vm0, %v2137_v63  ;;  %v885_v27 = vpop.xlane.xlu0 %884  ;;  %v887_v43 = vpop.xlane.xlu1 %886 }
 0x19f   :  { %1193 = vst.msk [vmem:[#allocation2 + $0x8] sm:$0xff] %vm2580_vm10, %v2140_v24  ;;  %v2157_v56 = vmax.f32 %v2142_v10, %v885_v27  ;;  %v2160_v57 = vmax.f32 %v2144_v55, %v887_v43  ;;  %v2183_v10 = vld [vmem:[#allocation2 + $0x28] sm:$0xff]  ;;  %v2596_v55 = vsel %vm1729_vm7, %v1893_v44, 0.0  ;;  %vm2604_vm7 = vnez %v2507_v49  ;;  %vm2611_vm10 = vmmov %vm2589_vm2 }
 0x1a1   :  { %2581 = vst [vmem:[#allocation21_spill] sm:$0xff] %v2157_v56  ;;  %1198 = vst.msk [vmem:[#allocation2 + $0x30] sm:$0xff] %vm2584_vm14, %v2157_v56  ;;  %1007 = vperm.xlu1 %1453, %v2140_v24   ;;  %vm2612_vm14 = vnez %v2495_v37 }
 0x1a2   :  { %1199 = vst.msk [vmem:[#allocation2 + $0x38] sm:$0xff] %vm2585_vm13, %v2160_v57  ;;  %v881_v27 = vpop.xlane.xlu0 %880  ;;  %v903_v43 = vpop.xlane.xlu1 %902  ;;  %v2613_v49 = vsel %vm2612_vm14, %v1837_v14, 0.0  ;;  %vm2614_vm13 = vnez %v2517_v6 }
 0x1a3   :  { %v2176_v23 = vmax.f32 %v2162_v26, %v881_v27  ;;  %v2179_v41 = vmax.f32 %v2164_v19, %v903_v43  ;;  %v2201_v26 = vld [vmem:[#allocation2 + $0x70] sm:$0xff]  ;;  %v2615_v42 = vsel %vm2614_vm13, %v1983_v15, 0.0  ;;  %v2630_v15 = vld [vmem:[#allocation6_spill] sm:$0xff] }
 0x1a5   :  { %2586 = vst [vmem:[#allocation24_spill] sm:$0xff] %v2179_v41  ;;  %1196 = vst.msk [vmem:[#allocation2 + $0x20] sm:$0xff] %vm2587_vm11, %v2176_v23  ;;  %1077 = vperm.xlu0 %1454, %v2179_v41   ;;  %1032 = vperm.xlu1 %1453, %v2157_v56  }
 0x1a6   :  { %1207 = vst.msk [vmem:[#allocation2 + $0x78] sm:$0xff] %vm2588_vm15, %v2179_v41  ;;  %v897_v27 = vpop.xlane.xlu0 %896  ;;  %v883_v43 = vpop.xlane.xlu1 %882  ;;  %v2595_v41 = vsel %vm1755_vm9, %v1937_v12, 0.0  ;;  %vm2606_vm9 = vmmov %vm2535_vm0  ;;  %vm2609_vm0 = vnez %v2503_v47  ;;  %vm2617_vm15 = vnez %v2519_v7 }
 0x1a7   :  { %v2196_v24 = vmax.f32 %v2181_v5, %v897_v27  ;;  %v2199_v63 = vmax.f32 %v2183_v10, %v883_v43  ;;  %v2610_v61 = vsel %vm2609_vm0, %v1877_v25, 0.0  ;;  %vm2616_vm11 = vmmov %vm2589_vm2  ;;  %v2618_v47 = vsel %vm2617_vm15, %v1943_v16, 0.0  ;;  %v2626_v16 = vld [vmem:[#allocation7_spill] sm:$0xff] }
 0x1a9   :  { %1204 = vst.msk [vmem:[#allocation2 + $0x60] sm:$0xff] %vm2589_vm2, %v2196_v24  ;;  %1022 = vperm.xlu1 %1453, %v2176_v23   ;;  %vm2619_vm2 = vnez %v2521_v8  ;;  %v2625_v8 = vsub.f32 %v2075_v4, %v2081_v28  ;;  %v2638_v28 = vld [vmem:[#allocation16_spill] sm:$0xff] }
 0x1aa   :  { %1197 = vst.msk [vmem:[#allocation2 + $0x28] sm:$0xff] %vm2590_vm6, %v2199_v63  ;;  %v2620_v37 = vsel %vm2619_vm2, %v1970_v38, 0.0  ;;  %vm2621_vm6 = vnez %v2523_v9 }
 0x1ab   :  { %v2622_v6 = vsel %vm2621_vm6, %v1919_v29, 0.0  ;;  %v2629_v29 = vld [vmem:[#allocation5_spill] sm:$0xff] }
 0x1ad   :  { %1062 = vperm.xlu1 %1453, %v2196_v24  }
 0x1b1   :  { %v901_v27 = vpop.xlane.xlu0 %900  ;;  %1037 = vperm.xlu1 %1453, %v2160_v57  }
 0x1b2   :  { %v899_v43 = vpop.xlane.xlu1 %898  ;;  %v2215_v19 = vmax.f32 %v2201_v26, %v901_v27  ;;  %v2593_v27 = vsel %vm1705_vm3, %v1853_v21, 0.0  ;;  %vm2598_vm3 = vnez %v2511_v59 }
 0x1b3   :  { %v2218_v56 = vmax.f32 %v2203_v0, %v899_v43  ;;  %v2594_v43 = vsel %vm1688_vm1, %v1833_v13, 0.0  ;;  %v2599_v35 = vsel %vm2598_vm3, %v1979_v53, 0.0  ;;  %vm2600_vm1 = vnez %v2513_v60  ;;  %vm2624_vm3 = vmmov %vm2591_vm4 }
 0x1b4   :  { %1206 = vst.msk [vmem:[#allocation2 + $0x70] sm:$0xff] %vm2591_vm4, %v2215_v19  ;;  %v2608_v60 = vsel %vm2607_vm12, %v1857_v22, 0.0 }
 0x1b5   :  { %1205 = vst.msk [vmem:[#allocation2 + $0x68] sm:$0xff] %vm2592_vm8, %v2218_v56  ;;  %1067 = vperm.xlu0 %1454, %v2218_v56   ;;  %1027 = vperm.xlu1 %1453, %v2199_v63   ;;  %vm2623_vm8 = vmmov %vm2591_vm4 }
 0x1b9   :  { %1072 = vperm.xlu1 %1453, %v2215_v19  }
 0x1d4   :  { %775 = vadd.xlane.f32.xlu0 %v2593_v27 }
 0x1d8   :  { %779 = vadd.xlane.f32.xlu0 %v2594_v43 }
 0x1dc   :  { %783 = vadd.xlane.f32.xlu0 %v2595_v41 }
 0x1dd   :  { %777 = vadd.xlane.f32.xlu1 %v2596_v55 }
 0x1e1   :  { %781 = vadd.xlane.f32.xlu1 %v2597_v40 }
 0x1e5   :  { %785 = vadd.xlane.f32.xlu1 %v2599_v35 }
 0x20c   :  { %v1013_v13 = vpop.permute.xlu1 %1012 }
 0x20d   :  { %v1082_v58 = vsub.f32 %v1843_v18, %v1013_v13 }
 0x20f   :  { %v1100_v21 = vmul.f32 1.442695, %v1082_v58 }
 0x210   :  { %v1003_v41 = vpop.permute.xlu0 %1002  ;;  %v1053_v12 = vpop.permute.xlu1 %1052 }
 0x211   :  { %1471 = vpow2.f32 %v1100_v21  ;;  %v1080_v48 = vsub.f32 %v1880_v34, %v1003_v41  ;;  %v1090_v44 = vsub.f32 %v1840_v17, %v1053_v12 }
 0x213   :  { %v1096_v45 = vmul.f32 1.442695, %v1080_v48  ;;  %v1116_v55 = vmul.f32 1.442695, %v1090_v44 }
 0x214   :  { %v1058_v30 = vpop.permute.xlu0 %1057  ;;  %v1043_v27 = vpop.permute.xlu1 %1042 }
 0x215   :  { %1473 = vpow2.f32 %v1096_v45  ;;  %v1088_v59 = vsub.f32 %v1922_v33, %v1043_v27  ;;  %v1091_v40 = vsub.f32 %v1925_v3, %v1058_v30 }
 0x216   :  { %1475 = vpow2.f32 %v1116_v55 }
 0x217   :  { %v1112_v53 = vmul.f32 1.442695, %v1088_v59  ;;  %v1118_v41 = vmul.f32 1.442695, %v1091_v40 }
 0x218   :  { %v1018_v43 = vpop.permute.xlu1 %1017  ;;  %v1048_v35 = vpop.permute.xlu0 %1047 }
 0x219   :  { %v1083_v18 = vsub.f32 %v1883_v36, %v1018_v43  ;;  %1477 = vpow2.f32 %v1112_v53  ;;  %v1089_v17 = vsub.f32 %v1954_v31, %v1048_v35 }
 0x21b   :  { %v1102_v13 = vmul.f32 1.442695, %v1083_v18  ;;  %v1114_v48 = vmul.f32 1.442695, %v1089_v17 }
 0x21c   :  { %v1008_v34 = vpop.permute.xlu1 %1007 }
 0x21d   :  { %v1081_v58 = vsub.f32 %v1966_v54, %v1008_v34  ;;  %1479 = vpow2.f32 %v1102_v13 }
 0x21e   :  { %v1472_v21 = vpop.eup %1471 }
 0x21f   :  { %v1098_v12 = vmul.f32 1.442695, %v1081_v58  ;;  %1132 = vadd.xlane.f32.xlu0 %v1472_v21 }
 0x220   :  { %v1033_v33 = vpop.permute.xlu1 %1032  ;;  %v1078_v30 = vpop.permute.xlu0 %1077 }
 0x221   :  { %1481 = vpow2.f32 %v1098_v12  ;;  %v1086_v36 = vsub.f32 %v1992_v11, %v1033_v33  ;;  %v1095_v53 = vsub.f32 %v2013_v20, %v1078_v30 }
 0x222   :  { %v1474_v44 = vpop.eup %1473  ;;  %1483 = vpow2.f32 %v1118_v41 }
 0x223   :  { %v1476_v3 = vpop.eup %1475  ;;  %v1108_v45 = vmul.f32 1.442695, %v1086_v36  ;;  %1128 = vadd.xlane.f32.xlu1 %v1474_v44  ;;  %1485 = vpow2.f32 %v1114_v48  ;;  %v1126_v13 = vmul.f32 1.442695, %v1095_v53  ;;  %v2631_v53 = vsub.f32 %v2629_v29, %v2630_v15 }
 0x224   :  { %1148 = vadd.xlane.f32.xlu0 %v1476_v3  ;;  %v1023_v55 = vpop.permute.xlu1 %1022 }
 0x225   :  { %1487 = vpow2.f32 %v1108_v45  ;;  %v1084_v41 = vsub.f32 %v2010_v52, %v1023_v55 }
 0x226   :  { %v1478_v31 = vpop.eup %1477 }
 0x227   :  { %v1104_v36 = vmul.f32 1.442695, %v1084_v41 }
 0x228   :  { %1144 = vadd.xlane.f32.xlu0 %v1478_v31  ;;  %v1063_v54 = vpop.permute.xlu1 %1062 }
 0x22a   :  { %v1480_v27 = vpop.eup %1479 }
 0x22b   :  { %1134 = vadd.xlane.f32.xlu1 %v1480_v27  ;;  %v2605_v27 = vsel %vm2604_vm7, %v1897_v46, 0.0  ;;  %v940_v46 = vmul.f32 1.442695, %v2625_v8  ;;  %v971_v8 = vld [vmem:[#allocation3 + $0x18] sm:$0xff] }
 0x22c   :  { %v1038_v59 = vpop.permute.xlu1 %1037 }
 0x22d   :  { %v1087_v11 = vsub.f32 %v1995_v32, %v1038_v59 }
 0x22e   :  { %v1482_v43 = vpop.eup %1481 }
 0x22f   :  { %v1484_v18 = vpop.eup %1483  ;;  %v1110_v40 = vmul.f32 1.442695, %v1087_v11  ;;  %1130 = vadd.xlane.f32.xlu0 %v1482_v43  ;;  %v956_v11 = vmul.f32 1.442695, %v2631_v53  ;;  %v2632_v43 = vld [vmem:[#allocation11_spill] sm:$0xff]  ;;  %v969_v53 = vld [vmem:[#allocation3 + $0x8] sm:$0xff] }
 0x230   :  { %1150 = vadd.xlane.f32.xlu1 %v1484_v18  ;;  %v1028_v35 = vpop.permute.xlu1 %1027  ;;  %v1486_v17 = vpop.eup %1485  ;;  %v2633_v18 = vld [vmem:[#allocation13_spill] sm:$0xff] }
 0x231   :  { %1489 = vpow2.f32 %v1110_v40  ;;  %v1085_v34 = vsub.f32 %v2025_v1, %v1028_v35  ;;  %v1068_v58 = vpop.permute.xlu0 %1067  ;;  %v1092_v1 = vsub.f32 %v2022_v50, %v1063_v54  ;;  %v2601_v50 = vsel %vm2600_vm1, %v1958_v39, 0.0  ;;  %v2627_v39 = vld [vmem:[#allocation9_spill] sm:$0xff]  ;;  %vm2650_vm1 = vmmov %vm2624_vm3 }
 0x232   :  { %v1488_v21 = vpop.eup %1487  ;;  %1491 = vpow2.f32 %v1126_v13  ;;  %v1093_v32 = vsub.f32 %v2069_v62, %v1068_v58  ;;  %v2603_v54 = vsel %vm2602_vm5, %v1913_v2, 0.0  ;;  %v2628_v9 = vsub.f32 %v2626_v16, %v2627_v39  ;;  %v2635_v13 = vld [vmem:[#allocation8_spill] sm:$0xff]  ;;  %v2639_v58 = vld [vmem:[#allocation18_spill] sm:$0xff]  ;;  %vm2651_vm5 = vmmov %vm2650_vm1 }
 0x233   :  { %v1106_v12 = vmul.f32 1.442695, %v1085_v34  ;;  %1140 = vadd.xlane.f32.xlu0 %v1488_v21  ;;  %v1120_v3 = vmul.f32 1.442695, %v1092_v1  ;;  %v2634_v40 = vsub.f32 %v2632_v43, %v2633_v18  ;;  %v2636_v34 = vld [vmem:[#allocation10_spill] sm:$0xff]  ;;  %v2640_v21 = vsub.f32 %v2638_v28, %v2639_v58  ;;  %v2645_v1 = vld [vmem:[#allocation17_spill] sm:$0xff]  ;;  %vm2652_vm7 = vmmov %vm2650_vm1 }
 0x234   :  { %1146 = vadd.xlane.f32.xlu1 %v1486_v17  ;;  %v1073_v20 = vpop.permute.xlu1 %1072  ;;  %v1122_v44 = vmul.f32 1.442695, %v1093_v32  ;;  %v936_v38 = vmul.f32 1.442695, %v2628_v9  ;;  %v2637_v17 = vsub.f32 %v2635_v13, %v2636_v34  ;;  %v2642_v32 = vld [vmem:[#allocation14_spill] sm:$0xff]  ;;  %v979_v18 = vld [vmem:[#allocation3 + $0x58] sm:$0xff]  ;;  %vm2659_vm12 = vmmov %vm2650_vm1 }
 0x235   :  { %v1094_v33 = vsub.f32 %v2066_v51, %v1073_v20  ;;  %1493 = vpow2.f32 %v1106_v12  ;;  %v952_v35 = vmul.f32 1.442695, %v2634_v40  ;;  %v938_v41 = vmul.f32 1.442695, %v2640_v21  ;;  %v2641_v20 = vld [vmem:[#allocation12_spill] sm:$0xff]  ;;  %v2656_v13 = vld [vmem:[#allocation23_spill] sm:$0xff]  ;;  %vm2662_vm0 = vmmov %vm2650_vm1 }
 0x236   :  { %v942_v4 = vmul.f32 1.442695, %v2637_v17  ;;  %v2657_v34 = vld [vmem:[#allocation24_spill] sm:$0xff]  ;;  %vm2667_vm14 = vmmov %vm2662_vm0 }
 0x237   :  { %v1124_v48 = vmul.f32 1.442695, %v1094_v33  ;;  %v2643_v33 = vsub.f32 %v2641_v20, %v2642_v32  ;;  %v2658_v17 = vsub.f32 %v2656_v13, %v2657_v34  ;;  %v974_v32 = vld [vmem:[#allocation3 + $0x30] sm:$0xff]  ;;  %vm2668_vm13 = vmmov %vm2662_vm0 }
 0x238   :  { %vm2671_vm15 = vmmov %vm2662_vm0 }
 0x239   :  { %1495 = vpow2.f32 %v1124_v48  ;;  %v958_v48 = vmul.f32 1.442695, %v2643_v33  ;;  %v977_v33 = vld [vmem:[#allocation3 + $0x48] sm:$0xff]  ;;  %vm2672_vm2 = vmmov %vm2662_vm0 }
 0x23a   :  { %1497 = vpow2.f32 %v1104_v36  ;;  %v970_v36 = vld [vmem:[#allocation3 + $0x10] sm:$0xff]  ;;  %vm2673_vm6 = vmmov %vm2662_vm0 }
 0x23b   :  { %1499 = vpow2.f32 %v1122_v44  ;;  %v2644_v44 = vld [vmem:[#allocation15_spill] sm:$0xff] }
 0x23c   :  { %1501 = vpow2.f32 %v1120_v3  ;;  %v2646_v3 = vsub.f32 %v2644_v44, %v2645_v1  ;;  %v2661_v1 = vsub.f32 %v2201_v26, %v2215_v19 }
 0x23d   :  { %1503 = vpow2.f32 %v940_v46  ;;  %v2653_v46 = vld [vmem:[#allocation20_spill] sm:$0xff] }
 0x23e   :  { %v1490_v52 = vpop.eup %1489  ;;  %1505 = vpow2.f32 %v936_v38  ;;  %v2654_v16 = vsub.f32 %v2653_v46, %v2160_v57 }
 0x23f   :  { %1142 = vadd.xlane.f32.xlu1 %v1490_v52  ;;  %v1492_v45 = vpop.eup %1491  ;;  %1507 = vpow2.f32 %v956_v11  ;;  %v954_v52 = vmul.f32 1.442695, %v2646_v3  ;;  %v964_v3 = vmul.f32 1.442695, %v2661_v1  ;;  %v1212_v1 = vld [vmem:[#allocation2 + $0x8] sm:$0xff] }
 0x240   :  { %1509 = vpow2.f32 %v952_v35  ;;  %v950_v39 = vmul.f32 1.442695, %v2654_v16 }
 0x241   :  { %1511 = vpow2.f32 %v942_v4  ;;  %v966_v4 = vmul.f32 1.442695, %v2658_v17  ;;  %v1214_v17 = vld [vmem:[#allocation2 + $0x18] sm:$0xff] }
 0x242   :  { %v1494_v55 = vpop.eup %1493  ;;  %1513 = vpow2.f32 %v938_v41 }
 0x243   :  { %1158 = vadd.xlane.f32.xlu1 %v1492_v45  ;;  %1515 = vpow2.f32 %v958_v48  ;;  %v2660_v48 = vsub.f32 %v2183_v10, %v2199_v63  ;;  %v2666_v10 = vsub.f32 %v2203_v0, %v2218_v56  ;;  %v2669_v56 = vsub.f32 %v2181_v5, %v2196_v24  ;;  %v983_v5 = vld [vmem:[#allocation3 + $0x78] sm:$0xff] }
 0x244   :  { %1517 = vpow2.f32 %v954_v52 }
 0x245   :  { %v962_v63 = vmul.f32 1.442695, %v2666_v10  ;;  %v960_v0 = vmul.f32 1.442695, %v2669_v56 }
 0x246   :  { %v1496_v31 = vpop.eup %1495 }
 0x247   :  { %1156 = vadd.xlane.f32.xlu0 %v1496_v31  ;;  %1138 = vadd.xlane.f32.xlu1 %v1494_v55  ;;  %v1498_v51 = vpop.eup %1497  ;;  %v2647_v31 = vld [vmem:[#allocation19_spill] sm:$0xff] }
 0x248   :  { %v1500_v62 = vpop.eup %1499 }
 0x249   :  { %v1502_v30 = vpop.eup %1501 }
 0x24a   :  { %v1504_v12 = vpop.eup %1503 }
 0x24b   :  { %1136 = vadd.xlane.f32.xlu0 %v1498_v51  ;;  %1154 = vadd.xlane.f32.xlu1 %v1500_v62  ;;  %v986_v45 = vmul.f32 %v1504_v12, %v970_v36  ;;  %v1506_v55 = vpop.eup %1505  ;;  %v2648_v51 = vld [vmem:[#allocation21_spill] sm:$0xff]  ;;  %v946_v36 = vmul.f32 1.442695, %v2660_v48 }
 0x24c   :  { %v2649_v62 = vsub.f32 %v2647_v31, %v2648_v51 }
 0x24f   :  { %1152 = vadd.xlane.f32.xlu0 %v1502_v30  ;;  %789 = vadd.xlane.f32.xlu1 %v2601_v50  ;;  %v948_v30 = vmul.f32 1.442695, %v2649_v62 }
 0x251   :  { %1519 = vpow2.f32 %v948_v30 }
 0x253   :  { %787 = vadd.xlane.f32.xlu0 %v2603_v54  ;;  %793 = vadd.xlane.f32.xlu1 %v2605_v27  ;;  %v968_v54 = vld [vmem:[#allocation3] sm:$0xff]  ;;  %v1508_v27 = vpop.eup %1507 }
 0x257   :  { %791 = vadd.xlane.f32.xlu0 %v2608_v60  ;;  %797 = vadd.xlane.f32.xlu1 %v2610_v61  ;;  %v978_v60 = vld [vmem:[#allocation3 + $0x50] sm:$0xff]  ;;  %v984_v61 = vmul.f32 %v1506_v55, %v968_v54  ;;  %v2664_v55 = vld [vmem:[#allocation22_spill] sm:$0xff] }
 0x258   :  { %v2665_v31 = vsub.f32 %v2664_v55, %v2176_v23 }
 0x25a   :  { %v944_v51 = vmul.f32 1.442695, %v2665_v31 }
 0x25b   :  { %795 = vadd.xlane.f32.xlu0 %v2613_v49  ;;  %801 = vadd.xlane.f32.xlu1 %v2615_v42  ;;  %v1510_v42 = vpop.eup %1509 }
 0x25d   :  { %v776_v59 = vpop.xlane.xlu0 %775 }
 0x25e   :  { %808 = vst.msk [vmem:[#allocation4] sm:$0xff] %vm2606_vm9, %v776_v59  ;;  %vm2655_vm9 = vmmov %vm2650_vm1 }
 0x25f   :  { %799 = vadd.xlane.f32.xlu0 %v2618_v47  ;;  %805 = vadd.xlane.f32.xlu1 %v2620_v37  ;;  %v976_v37 = vld [vmem:[#allocation3 + $0x40] sm:$0xff] }
 0x261   :  { %v780_v2 = vpop.xlane.xlu0 %779 }
 0x262   :  { %810 = vst.msk [vmem:[#allocation4 + $0x10] sm:$0xff] %vm2611_vm10, %v780_v2  ;;  %v994_v2 = vmul.f32 %v1508_v27, %v978_v60  ;;  %vm2663_vm10 = vmmov %vm2662_vm0  ;;  %v1213_v27 = vld [vmem:[#allocation2 + $0x10] sm:$0xff] }
 0x263   :  { %803 = vadd.xlane.f32.xlu0 %v2622_v6 }
 0x265   :  { %v784_v22 = vpop.xlane.xlu0 %783 }
 0x266   :  { %812 = vst.msk [vmem:[#allocation4 + $0x20] sm:$0xff] %vm2616_vm11, %v784_v22  ;;  %v778_v14 = vpop.xlane.xlu1 %777  ;;  %vm2670_vm11 = vmmov %vm2662_vm0 }
 0x267   :  { %809 = vst.msk [vmem:[#allocation4 + $0x8] sm:$0xff] %vm2591_vm4, %v778_v14  ;;  %v992_v14 = vmul.f32 %v1510_v42, %v976_v37  ;;  %v975_v42 = vld [vmem:[#allocation3 + $0x38] sm:$0xff]  ;;  %v1211_v37 = vld [vmem:[#allocation2] sm:$0xff]  ;;  %vm2674_vm4 = vmmov %vm2662_vm0 }
 0x26a   :  { %v782_v25 = vpop.xlane.xlu1 %781 }
 0x26b   :  { %811 = vst.msk [vmem:[#allocation4 + $0x18] sm:$0xff] %vm2623_vm8, %v782_v25  ;;  %v1512_v25 = vpop.eup %1511  ;;  %vm2675_vm8 = vmmov %vm2662_vm0 }
 0x26c   :  { %v1514_v29 = vpop.eup %1513  ;;  %v987_v15 = vmul.f32 %v1512_v25, %v971_v8 }
 0x26d   :  { %v1516_v11 = vpop.eup %1515  ;;  %v985_v57 = vmul.f32 %v1514_v29, %v969_v53  ;;  %v982_v53 = vld [vmem:[#allocation3 + $0x70] sm:$0xff] }
 0x26e   :  { %v786_v7 = vpop.xlane.xlu1 %785  ;;  %v1518_v28 = vpop.eup %1517  ;;  %v995_v21 = vmul.f32 %v1516_v11, %v979_v18  ;;  %v973_v11 = vld [vmem:[#allocation3 + $0x28] sm:$0xff] }
 0x26f   :  { %813 = vst.msk [vmem:[#allocation4 + $0x28] sm:$0xff] %vm2624_vm3, %v786_v7  ;;  %v1520_v41 = vpop.eup %1519  ;;  %vm2676_vm3 = vmmov %vm2662_vm0 }
 0x270   :  { %v990_v52 = vmul.f32 %v1520_v41, %v974_v32  ;;  %v981_v32 = vld [vmem:[#allocation3 + $0x68] sm:$0xff] }
 0x2a8   :  { %v1133_v50 = vpop.xlane.xlu0 %1132 }
 0x2a9   :  { %v1162_v59 = vadd.f32 %v1133_v50, %v986_v45  ;;  %v993_v45 = vmul.f32 %v1518_v28, %v977_v33  ;;  %v1294_v33 = vld [vmem:[#allocation4 + $0x18] sm:$0xff] }
 0x2ab   :  { %1178 = vst.msk [vmem:[#allocation3 + $0x10] sm:$0xff] %vm2650_vm1, %v1162_v59  ;;  %vm2677_vm1 = vmmov %vm2662_vm0 }
 0x2ac   :  { %v1129_v49 = vpop.xlane.xlu1 %1128 }
 0x2ad   :  { %v1149_v22 = vpop.xlane.xlu0 %1148  ;;  %v1160_v47 = vadd.f32 %v1129_v49, %v984_v61  ;;  %v1293_v49 = vld [vmem:[#allocation4 + $0x10] sm:$0xff] }
 0x2ae   :  { %v1170_v6 = vadd.f32 %v1149_v22, %v994_v2 }
 0x2af   :  { %1176 = vst.msk [vmem:[#allocation3] sm:$0xff] %vm2651_vm5, %v1160_v47  ;;  %vm2678_vm5 = vmmov %vm2662_vm0 }
 0x2b0   :  { %1186 = vst.msk [vmem:[#allocation3 + $0x50] sm:$0xff] %vm2652_vm7, %v1170_v6  ;;  %vm2679_vm7 = vmmov %vm2662_vm0 }
 0x2b1   :  { %v1145_v7 = vpop.xlane.xlu0 %1144 }
 0x2b2   :  { %v1229_v9 = vld [vmem:[#allocation3 + $0x10] sm:$0xff]  ;;  %v1168_v38 = vadd.f32 %v1145_v7, %v992_v14  ;;  %v1291_v7 = vld [vmem:[#allocation4] sm:$0xff] }
 0x2b3   :  { %1521 = vlog2.f32 %v1229_v9 }
 0x2b4   :  { %1184 = vst.msk [vmem:[#allocation3 + $0x40] sm:$0xff] %vm2655_vm9, %v1168_v38  ;;  %v1135_v43 = vpop.xlane.xlu1 %1134  ;;  %1523 = vpow2.f32 %v950_v39  ;;  %vm2680_vm9 = vmmov %vm2662_vm0 }
 0x2b5   :  { %v1163_v35 = vadd.f32 %v1135_v43, %v987_v15 }
 0x2b6   :  { %v1227_v40 = vld [vmem:[#allocation3] sm:$0xff] }
 0x2b7   :  { %1525 = vlog2.f32 %v1227_v40  ;;  %1179 = vst.msk [vmem:[#allocation3 + $0x18] sm:$0xff] %vm2659_vm12, %v1163_v35  ;;  %vm2681_vm12 = vmmov %vm2662_vm0 }
 0x2b8   :  { %v1131_v58 = vpop.xlane.xlu0 %1130  ;;  %1527 = vpow2.f32 %v966_v4 }
 0x2b9   :  { %v1161_v12 = vadd.f32 %v1131_v58, %v985_v57  ;;  %v1151_v20 = vpop.xlane.xlu1 %1150  ;;  %1529 = vpow2.f32 %v946_v36 }
 0x2ba   :  { %v1171_v44 = vadd.f32 %v1151_v20, %v995_v21  ;;  %1531 = vpow2.f32 %v964_v3  ;;  %v972_v20 = vld [vmem:[#allocation3 + $0x20] sm:$0xff] }
 0x2bb   :  { %1177 = vst.msk [vmem:[#allocation3 + $0x8] sm:$0xff] %vm2662_vm0, %v1161_v12  ;;  %v1235_v35 = vld [vmem:[#allocation3 + $0x40] sm:$0xff] }
 0x2bc   :  { %1187 = vst.msk [vmem:[#allocation3 + $0x58] sm:$0xff] %vm2663_vm10, %v1171_v44  ;;  %v1141_v62 = vpop.xlane.xlu0 %1140  ;;  %vm2682_vm10 = vmmov %vm2662_vm0 }
 0x2bd   :  { %v1147_v30 = vpop.xlane.xlu1 %1146  ;;  %v1166_v50 = vadd.f32 %v1141_v62, %v990_v52  ;;  %v1292_v62 = vld [vmem:[#allocation4 + $0x8] sm:$0xff] }
 0x2be   :  { %v1169_v19 = vadd.f32 %v1147_v30, %v993_v45  ;;  %v1230_v26 = vld [vmem:[#allocation3 + $0x18] sm:$0xff]  ;;  %v1237_v30 = vld [vmem:[#allocation3 + $0x50] sm:$0xff] }
 0x2bf   :  { %1533 = vlog2.f32 %v1230_v26  ;;  %1182 = vst.msk [vmem:[#allocation3 + $0x30] sm:$0xff] %vm2667_vm14, %v1166_v50  ;;  %v980_v50 = vld [vmem:[#allocation3 + $0x60] sm:$0xff]  ;;  %vm2683_vm14 = vmmov %vm2662_vm0 }
 0x2c0   :  { %v1522_v54 = vpop.eup %1521  ;;  %1185 = vst.msk [vmem:[#allocation3 + $0x48] sm:$0xff] %vm2668_vm13, %v1169_v19  ;;  %1535 = vpow2.f32 %v944_v51  ;;  %vm2684_vm13 = vmmov %vm2662_vm0 }
 0x2c1   :  { %v1248_v23 = vmul.f32 0.6931472, %v1522_v54  ;;  %1537 = vpow2.f32 %v962_v63  ;;  %v1524_v60 = vpop.eup %1523 }
 0x2c2   :  { %v1228_v59 = vld [vmem:[#allocation3 + $0x8] sm:$0xff]  ;;  %v991_v14 = vmul.f32 %v1524_v60, %v975_v42 }
 0x2c3   :  { %v1277_v61 = vadd.f32 %v1248_v23, %v1213_v27  ;;  %1539 = vlog2.f32 %v1228_v59  ;;  %v1238_v4 = vld [vmem:[#allocation3 + $0x58] sm:$0xff] }
 0x2c4   :  { %v1526_v2 = vpop.eup %1525  ;;  %1541 = vpow2.f32 %v960_v0 }
 0x2c5   :  { %v1309_v22 = vsub.f32 %v1277_v61, %v1293_v49  ;;  %v1244_v47 = vmul.f32 0.6931472, %v1526_v2  ;;  %v1528_v25 = vpop.eup %1527 }
 0x2c6   :  { %v1530_v16 = vpop.eup %1529  ;;  %v1233_v39 = vld [vmem:[#allocation3 + $0x30] sm:$0xff]  ;;  %v999_v9 = vmul.f32 %v1528_v25, %v983_v5 }
 0x2c7   :  { %1326 = vst.msk [vmem:[%s2459_s2 + $0x10] sm:$0xff] %vm2670_vm11, %v1309_v22  ;;  %v1275_v6 = vadd.f32 %v1244_v47, %v1211_v37  ;;  %v1532_v38 = vpop.eup %1531  ;;  %v1236_v29 = vld [vmem:[#allocation3 + $0x48] sm:$0xff]  ;;  %1543 = vlog2.f32 %v1233_v39  ;;  %v989_v28 = vmul.f32 %v1530_v16, %v973_v11  ;;  %vm2685_vm11 = vmmov %vm2662_vm0 }
 0x2c8   :  { %v1143_v24 = vpop.xlane.xlu1 %1142  ;;  %1545 = vlog2.f32 %v1236_v29  ;;  %v998_v57 = vmul.f32 %v1532_v38, %v982_v53  ;;  %v1220_v39 = vld [vmem:[#allocation2 + $0x48] sm:$0xff]  ;;  %v1217_v38 = vld [vmem:[#allocation2 + $0x30] sm:$0xff] }
 0x2c9   :  { %v1307_v8 = vsub.f32 %v1275_v6, %v1291_v7  ;;  %v1167_v46 = vadd.f32 %v1143_v24, %v991_v14  ;;  %1547 = vlog2.f32 %v1235_v35 }
 0x2ca   :  { %1549 = vlog2.f32 %v1238_v4 }
 0x2cb   :  { %1324 = vst.msk [vmem:[%s2459_s2] sm:$0xff] %vm2671_vm15, %v1307_v8  ;;  %vm2686_vm15 = vmmov %vm2662_vm0 }
 0x2cc   :  { %1183 = vst.msk [vmem:[#allocation3 + $0x38] sm:$0xff] %vm2672_vm2, %v1167_v46  ;;  %v1159_v15 = vpop.xlane.xlu1 %1158  ;;  %v1534_v43 = vpop.eup %1533  ;;  %v1218_v46 = vld [vmem:[#allocation2 + $0x38] sm:$0xff]  ;;  %vm2687_vm2 = vmmov %vm2662_vm0 }
 0x2cd   :  { %v1175_v18 = vadd.f32 %v1159_v15, %v999_v9  ;;  %v1536_v40 = vpop.eup %1535  ;;  %v1250_v13 = vmul.f32 0.6931472, %v1534_v43 }
 0x2ce   :  { %v1538_v34 = vpop.eup %1537  ;;  %v988_v55 = vmul.f32 %v1536_v40, %v972_v20 }
 0x2cf   :  { %1191 = vst.msk [vmem:[#allocation3 + $0x78] sm:$0xff] %vm2673_vm6, %v1175_v18  ;;  %v1278_v21 = vadd.f32 %v1250_v13, %v1214_v17  ;;  %v997_v31 = vmul.f32 %v1538_v34, %v981_v32  ;;  %vm2688_vm6 = vmmov %vm2662_vm0 }
 0x2d0   :  { %v1540_v58 = vpop.eup %1539  ;;  %v1157_v41 = vpop.xlane.xlu0 %1156 }
 0x2d1   :  { %v1139_v12 = vpop.xlane.xlu1 %1138  ;;  %v1246_v48 = vmul.f32 0.6931472, %v1540_v58  ;;  %v1174_v36 = vadd.f32 %v1157_v41, %v998_v57  ;;  %v1310_v3 = vsub.f32 %v1278_v21, %v1294_v33  ;;  %v1542_v51 = vpop.eup %1541  ;;  %v1219_v58 = vld [vmem:[#allocation2 + $0x40] sm:$0xff]  ;;  %v1222_v21 = vld [vmem:[#allocation2 + $0x58] sm:$0xff] }
 0x2d2   :  { %v1165_v44 = vadd.f32 %v1139_v12, %v989_v28  ;;  %v996_v23 = vmul.f32 %v1542_v51, %v980_v50  ;;  %v1216_v51 = vld [vmem:[#allocation2 + $0x28] sm:$0xff] }
 0x2d3   :  { %v1234_v52 = vld [vmem:[#allocation3 + $0x38] sm:$0xff]  ;;  %v1276_v45 = vadd.f32 %v1246_v48, %v1212_v1  ;;  %1190 = vst.msk [vmem:[#allocation3 + $0x70] sm:$0xff] %vm2674_vm4, %v1174_v36  ;;  %vm2689_vm4 = vmmov %vm2662_vm0 }
 0x2d4   :  { %1551 = vlog2.f32 %v1234_v52  ;;  %1181 = vst.msk [vmem:[#allocation3 + $0x28] sm:$0xff] %vm2675_vm8, %v1165_v44  ;;  %v1137_v10 = vpop.xlane.xlu0 %1136  ;;  %v1544_v61 = vpop.eup %1543  ;;  %vm2690_vm8 = vmmov %vm2662_vm0 }
 0x2d5   :  { %1327 = vst.msk [vmem:[%s2459_s2 + $0x18] sm:$0xff] %vm2676_vm3, %v1310_v3  ;;  %v1155_v63 = vpop.xlane.xlu1 %1154  ;;  %v1308_v19 = vsub.f32 %v1276_v45, %v1292_v62  ;;  %v1164_v26 = vadd.f32 %v1137_v10, %v988_v55  ;;  %1553 = vlog2.f32 %v1237_v30  ;;  %v1546_v49 = vpop.eup %1545  ;;  %v1256_v25 = vmul.f32 0.6931472, %v1544_v61  ;;  %vm2691_vm3 = vmmov %vm2662_vm0  ;;  %v1221_v55 = vld [vmem:[#allocation2 + $0x50] sm:$0xff] }
 0x2d6   :  { %v1173_v54 = vadd.f32 %v1155_v63, %v997_v31  ;;  %v1242_v27 = vld [vmem:[#allocation3 + $0x78] sm:$0xff]  ;;  %v1548_v47 = vpop.eup %1547  ;;  %v1262_v7 = vmul.f32 0.6931472, %v1546_v49 }
 0x2d7   :  { %1325 = vst.msk [vmem:[%s2459_s2 + $0x8] sm:$0xff] %vm2677_vm1, %v1308_v19  ;;  %1555 = vlog2.f32 %v1242_v27  ;;  %v1550_v14 = vpop.eup %1549  ;;  %v1260_v29 = vmul.f32 0.6931472, %v1548_v47  ;;  %v1281_v11 = vadd.f32 %v1256_v25, %v1217_v38  ;;  %vm2692_vm1 = vmmov %vm2662_vm0  ;;  %v1295_v47 = vld [vmem:[#allocation4 + $0x20] sm:$0xff] }
 0x2d8   :  { %1180 = vst.msk [vmem:[#allocation3 + $0x20] sm:$0xff] %vm2678_vm5, %v1164_v26  ;;  %v1153_v59 = vpop.xlane.xlu0 %1152  ;;  %v1266_v15 = vmul.f32 0.6931472, %v1550_v14  ;;  %v1284_v43 = vadd.f32 %v1262_v7, %v1220_v39  ;;  %vm2693_vm5 = vmmov %vm2662_vm0 }
 0x2d9   :  { %1189 = vst.msk [vmem:[#allocation3 + $0x68] sm:$0xff] %vm2679_vm7, %v1173_v54  ;;  %v790_v60 = vpop.xlane.xlu1 %789  ;;  %v1172_v56 = vadd.f32 %v1153_v59, %v996_v23  ;;  %v1283_v41 = vadd.f32 %v1260_v29, %v1219_v58  ;;  %v1296_v54 = vld [vmem:[#allocation4 + $0x28] sm:$0xff]  ;;  %vm2694_vm7 = vmmov %vm2662_vm0  ;;  %v1215_v59 = vld [vmem:[#allocation2 + $0x20] sm:$0xff] }
 0x2da   :  { %815 = vst.msk [vmem:[#allocation4 + $0x38] sm:$0xff] %vm2680_vm9, %v790_v60  ;;  %v1241_v2 = vld [vmem:[#allocation3 + $0x70] sm:$0xff]  ;;  %v1286_v12 = vadd.f32 %v1266_v15, %v1222_v21  ;;  %vm2695_vm9 = vmmov %vm2662_vm0 }
 0x2db   :  { %v1232_v0 = vld [vmem:[#allocation3 + $0x28] sm:$0xff]  ;;  %1188 = vst.msk [vmem:[#allocation3 + $0x60] sm:$0xff] %vm2681_vm12, %v1172_v56  ;;  %vm2696_vm12 = vmmov %vm2662_vm0 }
 0x2dc   :  { %1557 = vlog2.f32 %v1232_v0  ;;  %v788_v42 = vpop.xlane.xlu0 %787  ;;  %v1226_v0 = vld [vmem:[#allocation2 + $0x78] sm:$0xff] }
 0x2dd   :  { %v794_v22 = vpop.xlane.xlu1 %793  ;;  %814 = vst.msk [vmem:[#allocation4 + $0x30] sm:$0xff] %vm2662_vm0, %v788_v42  ;;  %1559 = vlog2.f32 %v1241_v2  ;;  %v1224_v2 = vld [vmem:[#allocation2 + $0x68] sm:$0xff] }
 0x2de   :  { %817 = vst.msk [vmem:[#allocation4 + $0x48] sm:$0xff] %vm2682_vm10, %v794_v22  ;;  %vm2697_vm10 = vmmov %vm2662_vm0 }
 0x2df   :  { %v1231_v37 = vld [vmem:[#allocation3 + $0x20] sm:$0xff] }
 0x2e0   :  { %v1240_v6 = vld [vmem:[#allocation3 + $0x68] sm:$0xff]  ;;  %1561 = vlog2.f32 %v1231_v37  ;;  %v792_v5 = vpop.xlane.xlu0 %791 }
 0x2e1   :  { %v1552_v24 = vpop.eup %1551  ;;  %1563 = vlog2.f32 %v1240_v6  ;;  %v798_v8 = vpop.xlane.xlu1 %797  ;;  %816 = vst.msk [vmem:[#allocation4 + $0x40] sm:$0xff] %vm2683_vm14, %v792_v5  ;;  %v1298_v40 = vld [vmem:[#allocation4 + $0x38] sm:$0xff]  ;;  %vm2698_vm14 = vmmov %vm2662_vm0 }
 0x2e2   :  { %v1258_v16 = vmul.f32 0.6931472, %v1552_v24  ;;  %819 = vst.msk [vmem:[#allocation4 + $0x58] sm:$0xff] %vm2684_vm13, %v798_v8  ;;  %v1239_v9 = vld [vmem:[#allocation3 + $0x60] sm:$0xff]  ;;  %v1554_v18 = vpop.eup %1553  ;;  %vm2699_vm13 = vmmov %vm2662_vm0 }
 0x2e3   :  { %1565 = vlog2.f32 %v1239_v9  ;;  %v1264_v20 = vmul.f32 0.6931472, %v1554_v18  ;;  %v1223_v8 = vld [vmem:[#allocation2 + $0x60] sm:$0xff] }
 0x2e4   :  { %v1282_v53 = vadd.f32 %v1258_v16, %v1218_v46  ;;  %v1297_v35 = vld [vmem:[#allocation4 + $0x30] sm:$0xff]  ;;  %v796_v34 = vpop.xlane.xlu0 %795  ;;  %v1556_v32 = vpop.eup %1555 }
 0x2e5   :  { %v1300_v13 = vld [vmem:[#allocation4 + $0x48] sm:$0xff]  ;;  %v802_v17 = vpop.xlane.xlu1 %801  ;;  %v1313_v57 = vsub.f32 %v1281_v11, %v1297_v35  ;;  %818 = vst.msk [vmem:[#allocation4 + $0x50] sm:$0xff] %vm2685_vm11, %v796_v34  ;;  %v1285_v62 = vadd.f32 %v1264_v20, %v1221_v55  ;;  %v1274_v30 = vmul.f32 0.6931472, %v1556_v32  ;;  %v1225_v46 = vld [vmem:[#allocation2 + $0x70] sm:$0xff]  ;;  %vm2700_vm11 = vmmov %vm2662_vm0 }
 0x2e6   :  { %v1314_v4 = vsub.f32 %v1282_v53, %v1298_v40  ;;  %v1316_v28 = vsub.f32 %v1284_v43, %v1300_v13  ;;  %821 = vst.msk [vmem:[#allocation4 + $0x68] sm:$0xff] %vm2686_vm15, %v802_v17 }
 0x2e7   :  { %1330 = vst.msk [vmem:[%s2459_s2 + $0x30] sm:$0xff] %vm2688_vm6, %v1313_v57  ;;  %v1290_v49 = vadd.f32 %v1274_v30, %v1226_v0 }
 0x2e8   :  { %1331 = vst.msk [vmem:[%s2459_s2 + $0x38] sm:$0xff] %vm2687_vm2, %v1314_v4  ;;  %v1299_v33 = vld [vmem:[#allocation4 + $0x40] sm:$0xff]  ;;  %v800_v36 = vpop.xlane.xlu0 %799 }
 0x2e9   :  { %1333 = vst.msk [vmem:[%s2459_s2 + $0x48] sm:$0xff] %vm2689_vm4, %v1316_v28  ;;  %v1302_v48 = vld [vmem:[#allocation4 + $0x58] sm:$0xff]  ;;  %v806_v44 = vpop.xlane.xlu1 %805  ;;  %v1558_v1 = vpop.eup %1557  ;;  %v1315_v3 = vsub.f32 %v1283_v41, %v1299_v33 }
 0x2ea   :  { %v1318_v52 = vsub.f32 %v1286_v12, %v1302_v48  ;;  %820 = vst.msk [vmem:[#allocation4 + $0x60] sm:$0xff] %vm2690_vm8, %v800_v36  ;;  %v1254_v45 = vmul.f32 0.6931472, %v1558_v1  ;;  %v1560_v31 = vpop.eup %1559 }
 0x2eb   :  { %823 = vst.msk [vmem:[#allocation4 + $0x78] sm:$0xff] %vm2691_vm3, %v806_v44  ;;  %v1272_v42 = vmul.f32 0.6931472, %v1560_v31 }
 0x2ec   :  { %1332 = vst.msk [vmem:[%s2459_s2 + $0x40] sm:$0xff] %vm2692_vm1, %v1315_v3  ;;  %v1280_v63 = vadd.f32 %v1254_v45, %v1216_v51  ;;  %v1301_v50 = vld [vmem:[#allocation4 + $0x50] sm:$0xff]  ;;  %v804_v19 = vpop.xlane.xlu0 %803 }
 0x2ed   :  { %1335 = vst.msk [vmem:[%s2459_s2 + $0x58] sm:$0xff] %vm2693_vm5, %v1318_v52  ;;  %v1562_v10 = vpop.eup %1561  ;;  %v1317_v27 = vsub.f32 %v1285_v62, %v1301_v50  ;;  %v1304_v25 = vld [vmem:[#allocation4 + $0x68] sm:$0xff]  ;;  %v1289_v39 = vadd.f32 %v1272_v42, %v1225_v46 }
 0x2ee   :  { %v1564_v26 = vpop.eup %1563  ;;  %v1252_v23 = vmul.f32 0.6931472, %v1562_v10  ;;  %822 = vst.msk [vmem:[#allocation4 + $0x70] sm:$0xff] %vm2694_vm7, %v804_v19  ;;  %v1312_v60 = vsub.f32 %v1280_v63, %v1296_v54 }
 0x2ef   :  { %v1270_v56 = vmul.f32 0.6931472, %v1564_v26  ;;  %1334 = vst.msk [vmem:[%s2459_s2 + $0x50] sm:$0xff] %vm2695_vm9, %v1317_v27 }
 0x2f0   :  { %v1279_v61 = vadd.f32 %v1252_v23, %v1215_v59  ;;  %v1566_v22 = vpop.eup %1565  ;;  %1329 = vst.msk [vmem:[%s2459_s2 + $0x28] sm:$0xff] %vm2696_vm12, %v1312_v60 }
 0x2f1   :  { %v1288_v37 = vadd.f32 %v1270_v56, %v1224_v2  ;;  %v1268_v7 = vmul.f32 0.6931472, %v1566_v22  ;;  %v1303_v9 = vld [vmem:[#allocation4 + $0x60] sm:$0xff] }
 0x2f2   :  { %v1306_v6 = vld [vmem:[#allocation4 + $0x78] sm:$0xff]  ;;  %v1311_v14 = vsub.f32 %v1279_v61, %v1295_v47 }
 0x2f3   :  { %v1322_v24 = vsub.f32 %v1290_v49, %v1306_v6  ;;  %v1320_v5 = vsub.f32 %v1288_v37, %v1304_v25  ;;  %v1287_v16 = vadd.f32 %v1268_v7, %v1223_v8 }
 0x2f4   :  { %1328 = vst.msk [vmem:[%s2459_s2 + $0x20] sm:$0xff] %vm2662_vm0, %v1311_v14 }
 0x2f5   :  { %1339 = vst.msk [vmem:[%s2459_s2 + $0x78] sm:$0xff] %vm2697_vm10, %v1322_v24  ;;  %v1305_v38 = vld [vmem:[#allocation4 + $0x70] sm:$0xff]  ;;  %v1319_v29 = vsub.f32 %v1287_v16, %v1303_v9 }
 0x2f6   :  { %1337 = vst.msk [vmem:[%s2459_s2 + $0x68] sm:$0xff] %vm2698_vm14, %v1320_v5  ;;  %v1321_v15 = vsub.f32 %v1289_v39, %v1305_v38 }
 0x2f7   :  { %1336 = vst.msk [vmem:[%s2459_s2 + $0x60] sm:$0xff] %vm2699_vm13, %v1319_v29 }
 0x2f8   :  { %1338 = vst.msk [vmem:[%s2459_s2 + $0x70] sm:$0xff] %vm2700_vm11, %v1321_v15 }

</bundles_post_ra>
